<compile_context>
chip_gen: v6e
topology: v6e:2x2x1
jax: 0.10.0
libtpu: 0.0.40
codegen_flags: <defaults>
</compile_context>

<pallas_src>
import functools

import jax
import jax.numpy as jnp
from jax import lax
from jax.experimental import pallas as pl
from jax.experimental.pallas import tpu as pltpu


# ----------------------------- Fused Pallas kernel --------------------------

def _mlm_fused_kernel(num_layers, S, H, scale, *refs):
    """refs = (x, mask_add, <flat params...>, out, logits).

    Param order: emb_w, emb_b, pos1_w, pos1_b, pos2_w, pos2_b,
                 per layer: wq, bq, wk, bk, wv, bv, wo, bo, w1, b1, w2, b2,
                            ln1_g, ln1_b, ln2_g, ln2_b,
                 mlm_w, mlm_b.
    All weights are (K, N); biases / LN params are (1, N).
    """
    x_ref, mask_ref = refs[0], refs[1]
    out_ref, logits_ref = refs[-2], refs[-1]
    prm = iter(refs[2:-2])

    def rd():
        return next(prm)[...]

    def lin(h, w, b, relu=False):
        y = jnp.dot(h, w, preferred_element_type=jnp.float32) + b
        return jnp.maximum(y, 0.0) if relu else y

    def layer_norm(y, g, b, eps=1e-5):
        mu = jnp.mean(y, axis=-1, keepdims=True)
        c = y - mu
        var = jnp.mean(c * c, axis=-1, keepdims=True)
        return c * lax.rsqrt(var + eps) * g + b

    bb = x_ref.shape[0]                      # batch rows in this block
    in_f = x_ref.shape[-1]

    x = x_ref[...].reshape(bb * S, in_f)     # (bb*S, In)
    mask_add = mask_ref[...]                 # (bb, 1, S) additive key-padding mask

    emb_w, emb_b = rd(), rd()
    p1_w, p1_b = rd(), rd()
    p2_w, p2_b = rd(), rd()

    h = lin(x, emb_w, emb_b)                 # embedding
    h = lin(h, p1_w, p1_b, relu=True)        # pos_encoder MLP
    h = lin(h, p2_w, p2_b)

    for _ in range(num_layers):
        wq, bq, wk, bk, wv, bv = rd(), rd(), rd(), rd(), rd(), rd()
        wo, bo, w1, b1f, w2, b2f = rd(), rd(), rd(), rd(), rd(), rd()
        g1, be1, g2, be2 = rd(), rd(), rd(), rd()

        # --- single-head self-attention (post-norm layer) ---
        q = (lin(h, wq, bq) * scale).reshape(bb, S, H)   # scale folded into Q
        k = lin(h, wk, bk).reshape(bb, S, H)
        v = lin(h, wv, bv).reshape(bb, S, H)

        # batched Q.K^T without an explicit transpose of K
        s = lax.dot_general(q, k, (((2,), (2,)), ((0,), (0,))),
                            preferred_element_type=jnp.float32)   # (bb, S, S)
        s = s + mask_add
        s = s - jnp.max(s, axis=-1, keepdims=True)
        e = jnp.exp(s)
        p = e * pl.reciprocal(jnp.sum(e, axis=-1, keepdims=True), approx=True)
        a = lax.dot_general(p, v, (((2,), (1,)), ((0,), (0,))),
                            preferred_element_type=jnp.float32)   # (bb, S, H)

        a = lin(a.reshape(bb * S, H), wo, bo)
        h = layer_norm(h + a, g1, be1)

        # --- feed-forward ---
        f = lin(h, w1, b1f, relu=True)
        f = lin(f, w2, b2f)
        h = layer_norm(h + f, g2, be2)

    mlm_w, mlm_b = rd(), rd()
    out_ref[...] = h.reshape(bb, S, H).astype(out_ref.dtype)
    logits = lin(h, mlm_w, mlm_b)
    logits_ref[...] = logits.reshape(bb, S, logits_ref.shape[-1]).astype(logits_ref.dtype)


# ----------------------------- Wrapper --------------------------------------

def mlm_encoder_forward(params, x, mask, *, block_b=None):
    """x: (B, S, input_size) float32; mask: (B, S) bool (True = padding)."""
    B, S, In = x.shape
    H = params["hidden"]
    L = len(params["layers"])
    if block_b is None:
        block_b = B                       # single grid step at toy sizes
    assert B % block_b == 0
    scale = 1.0 / (H ** 0.5)

    # additive key-padding mask, computed once (tiny)
    mask_add = jnp.where(mask, -1e9, 0.0).astype(jnp.float32)[:, None, :]  # (B,1,S)

    flat = [params["embedding"][0], params["embedding"][1],
            params["pos1"][0], params["pos1"][1],
            params["pos2"][0], params["pos2"][1]]
    for lp in params["layers"]:
        flat += [lp["wq"], lp["bq"], lp["wk"], lp["bk"], lp["wv"], lp["bv"],
                 lp["wo"], lp["bo"], lp["w1"], lp["b1"], lp["w2"], lp["b2"],
                 lp["ln1_g"], lp["ln1_b"], lp["ln2_g"], lp["ln2_b"]]
    flat += [params["mlm_head"][0], params["mlm_head"][1]]

    def batch_map(b):
        return (b, 0, 0)

    def const_map(b):
        return (0, 0)

    in_specs = [pl.BlockSpec((block_b, S, In), batch_map),
                pl.BlockSpec((block_b, 1, S), batch_map)]
    in_specs += [pl.BlockSpec(p.shape, const_map) for p in flat]

    out_specs = (pl.BlockSpec((block_b, S, H), batch_map),
                 pl.BlockSpec((block_b, S, In), batch_map))

    kernel = functools.partial(_mlm_fused_kernel, L, S, H, scale)
    out, logits = pl.pallas_call(
        kernel,
        grid=(B // block_b,),
        out_shape=(jax.ShapeDtypeStruct((B, S, H), jnp.float32),
                   jax.ShapeDtypeStruct((B, S, In), jnp.float32)),
        in_specs=in_specs,
        out_specs=out_specs,
        compiler_params=pltpu.CompilerParams(
            dimension_semantics=("parallel",)),
    )(x, mask_add, *flat)
    return out, logits


# ----------------------------- Parameters -----------------------------------

def _init_linear(key, in_f, out_f):
    """Weights stored pre-transposed as (in_f, out_f); bias as (1, out_f)."""
    k1, k2 = jax.random.split(key)
    bound = 1.0 / (in_f ** 0.5)
    w = jax.random.uniform(k1, (in_f, out_f), jnp.float32, -bound, bound)
    b = jax.random.uniform(k2, (1, out_f), jnp.float32, -bound, bound)
    return w, b


def init_params(key, input_size, hidden_size, num_layers):
    keys = jax.random.split(key, 4 + 6 * num_layers)
    H = hidden_size
    p = {
        "hidden": H,
        "embedding": _init_linear(keys[0], input_size, H),
        "pos1": _init_linear(keys[1], H, H),
        "pos2": _init_linear(keys[2], H, H),
        "mlm_head": _init_linear(keys[3], H, input_size),
        "layers": [],
    }
    for l in range(num_layers):
        kb = 4 + 6 * l
        wq, bq = _init_linear(keys[kb + 0], H, H)      # split of torch in_proj
        wk, bk = _init_linear(keys[kb + 1], H, H)
        wv, bv = _init_linear(keys[kb + 2], H, H)
        wo, bo = _init_linear(keys[kb + 3], H, H)
        w1, b1 = _init_linear(keys[kb + 4], H, H)      # dim_feedforward = hidden_size
        w2, b2 = _init_linear(keys[kb + 5], H, H)
        p["layers"].append({
            "wq": wq, "bq": bq, "wk": wk, "bk": bk, "wv": wv, "bv": bv,
            "wo": wo, "bo": bo, "w1": w1, "b1": b1, "w2": w2, "b2": b2,
            "ln1_g": jnp.ones((1, H), jnp.float32),
            "ln1_b": jnp.zeros((1, H), jnp.float32),
            "ln2_g": jnp.ones((1, H), jnp.float32),
            "ln2_b": jnp.zeros((1, H), jnp.float32),
        })
    return p


# ----------------------------- Reference (plain JAX) -------------------------

def _ref_ln(x, g, b, eps=1e-5):
    m = jnp.mean(x, axis=-1, keepdims=True)
    v = jnp.mean((x - m) ** 2, axis=-1, keepdims=True)
    return (x - m) * lax.rsqrt(v + eps) * g + b


def reference_forward(params, x, mask):
    H = params["hidden"]

    def lin(t, wb):
        w, b = wb
        return t @ w + b

    h = lin(x, params["embedding"])
    h = jnp.maximum(lin(h, params["pos1"]), 0.0)
    h = lin(h, params["pos2"])
    mask_add = jnp.where(mask, -1e9, 0.0)[:, None, :]
    scale = 1.0 / (H ** 0.5)
    for lp in params["layers"]:
        q = (h @ lp["wq"] + lp["bq"]) * scale
        k = h @ lp["wk"] + lp["bk"]
        v = h @ lp["wv"] + lp["bv"]
        s = jnp.einsum("bqd,bkd->bqk", q, k) + mask_add
        p = jax.nn.softmax(s, axis=-1)
        a = jnp.einsum("bqk,bkd->bqd", p, v)
        a = a @ lp["wo"] + lp["bo"]
        h = _ref_ln(h + a, lp["ln1_g"], lp["ln1_b"])
        f = jnp.maximum(h @ lp["w1"] + lp["b1"], 0.0)
        f = f @ lp["w2"] + lp["b2"]
        h = _ref_ln(h + f, lp["ln2_g"], lp["ln2_b"])
    logits = lin(h, params["mlm_head"])
    return h, logits


# ----------------------------- Main ------------------------------------------

if __name__ == "__main__":
    B, S = 2, 8
    input_size, hidden_size, num_layers = 16, 32, 2

    key = jax.random.PRNGKey(0)
    kp, kx = jax.random.split(key)
    params = init_params(kp, input_size, hidden_size, num_layers)

    x = jax.random.normal(kx, (B, S, input_size), jnp.float32)
    lengths = jnp.array([8, 5], jnp.int32)
    mask = jnp.arange(S)[None, :] >= lengths[:, None]          # (B, S) bool, True = pad

    output, logits = mlm_encoder_forward(params, x, mask)
    output = jax.block_until_ready(output)
    logits = jax.block_until_ready(logits)

    ref_out, ref_logits = reference_forward(params, x, mask)
    assert output.shape == (B, S, hidden_size)
    assert logits.shape == (B, S, input_size)
    assert jnp.allclose(output, ref_out, atol=1e-2, rtol=1e-2), "output mismatch"
    assert jnp.allclose(logits, ref_logits, atol=1e-2, rtol=1e-2), "logits mismatch"

    print("KERNEL_OK")
</pallas_src>

<mosaic_0001>
module attributes {stable_mosaic.version = 11 : i64} {
  func.func @_mlm_fused_kernel(%arg0: i32, %arg1: memref<2x8x16xf32, #tpu.memory_space<vmem>>, %arg2: memref<2x1x8xf32, #tpu.memory_space<vmem>>, %arg3: memref<16x32xf32, #tpu.memory_space<vmem>>, %arg4: memref<1x32xf32, #tpu.memory_space<vmem>>, %arg5: memref<32x32xf32, #tpu.memory_space<vmem>>, %arg6: memref<1x32xf32, #tpu.memory_space<vmem>>, %arg7: memref<32x32xf32, #tpu.memory_space<vmem>>, %arg8: memref<1x32xf32, #tpu.memory_space<vmem>>, %arg9: memref<32x32xf32, #tpu.memory_space<vmem>>, %arg10: memref<1x32xf32, #tpu.memory_space<vmem>>, %arg11: memref<32x32xf32, #tpu.memory_space<vmem>>, %arg12: memref<1x32xf32, #tpu.memory_space<vmem>>, %arg13: memref<32x32xf32, #tpu.memory_space<vmem>>, %arg14: memref<1x32xf32, #tpu.memory_space<vmem>>, %arg15: memref<32x32xf32, #tpu.memory_space<vmem>>, %arg16: memref<1x32xf32, #tpu.memory_space<vmem>>, %arg17: memref<32x32xf32, #tpu.memory_space<vmem>>, %arg18: memref<1x32xf32, #tpu.memory_space<vmem>>, %arg19: memref<32x32xf32, #tpu.memory_space<vmem>>, %arg20: memref<1x32xf32, #tpu.memory_space<vmem>>, %arg21: memref<1x32xf32, #tpu.memory_space<vmem>>, %arg22: memref<1x32xf32, #tpu.memory_space<vmem>>, %arg23: memref<1x32xf32, #tpu.memory_space<vmem>>, %arg24: memref<1x32xf32, #tpu.memory_space<vmem>>, %arg25: memref<32x32xf32, #tpu.memory_space<vmem>>, %arg26: memref<1x32xf32, #tpu.memory_space<vmem>>, %arg27: memref<32x32xf32, #tpu.memory_space<vmem>>, %arg28: memref<1x32xf32, #tpu.memory_space<vmem>>, %arg29: memref<32x32xf32, #tpu.memory_space<vmem>>, %arg30: memref<1x32xf32, #tpu.memory_space<vmem>>, %arg31: memref<32x32xf32, #tpu.memory_space<vmem>>, %arg32: memref<1x32xf32, #tpu.memory_space<vmem>>, %arg33: memref<32x32xf32, #tpu.memory_space<vmem>>, %arg34: memref<1x32xf32, #tpu.memory_space<vmem>>, %arg35: memref<32x32xf32, #tpu.memory_space<vmem>>, %arg36: memref<1x32xf32, #tpu.memory_space<vmem>>, %arg37: memref<1x32xf32, #tpu.memory_space<vmem>>, %arg38: memref<1x32xf32, #tpu.memory_space<vmem>>, %arg39: memref<1x32xf32, #tpu.memory_space<vmem>>, %arg40: memref<1x32xf32, #tpu.memory_space<vmem>>, %arg41: memref<32x16xf32, #tpu.memory_space<vmem>>, %arg42: memref<1x16xf32, #tpu.memory_space<vmem>>, %arg43: memref<2x8x32xf32, #tpu.memory_space<vmem>>, %arg44: memref<2x8x16xf32, #tpu.memory_space<vmem>>) attributes {dimension_semantics = [#tpu.dimension_semantics<parallel>], iteration_bounds = array<i64: 1>, scalar_prefetch = 0 : i64, scratch_operands = 0 : i64, tpu.core_type = #tpu.core_type<tc>, window_params = [{transform_indices = @transform_0, window_bounds = array<i64: 2, 8, 16>}, {transform_indices = @transform_1, window_bounds = array<i64: 2, 1, 8>}, {pipeline_mode = #tpu.pipeline_mode<synchronous>, transform_indices = @transform_2, window_bounds = array<i64: 16, 32>}, {pipeline_mode = #tpu.pipeline_mode<synchronous>, transform_indices = @transform_3, window_bounds = array<i64: 1, 32>}, {pipeline_mode = #tpu.pipeline_mode<synchronous>, transform_indices = @transform_4, window_bounds = array<i64: 32, 32>}, {pipeline_mode = #tpu.pipeline_mode<synchronous>, transform_indices = @transform_5, window_bounds = array<i64: 1, 32>}, {pipeline_mode = #tpu.pipeline_mode<synchronous>, transform_indices = @transform_6, window_bounds = array<i64: 32, 32>}, {pipeline_mode = #tpu.pipeline_mode<synchronous>, transform_indices = @transform_7, window_bounds = array<i64: 1, 32>}, {pipeline_mode = #tpu.pipeline_mode<synchronous>, transform_indices = @transform_8, window_bounds = array<i64: 32, 32>}, {pipeline_mode = #tpu.pipeline_mode<synchronous>, transform_indices = @transform_9, window_bounds = array<i64: 1, 32>}, {pipeline_mode = #tpu.pipeline_mode<synchronous>, transform_indices = @transform_10, window_bounds = array<i64: 32, 32>}, {pipeline_mode = #tpu.pipeline_mode<synchronous>, transform_indices = @transform_11, window_bounds = array<i64: 1, 32>}, {pipeline_mode = #tpu.pipeline_mode<synchronous>, transform_indices = @transform_12, window_bounds = array<i64: 32, 32>}, {pipeline_mode = #tpu.pipeline_mode<synchronous>, transform_indices = @transform_13, window_bounds = array<i64: 1, 32>}, {pipeline_mode = #tpu.pipeline_mode<synchronous>, transform_indices = @transform_14, window_bounds = array<i64: 32, 32>}, {pipeline_mode = #tpu.pipeline_mode<synchronous>, transform_indices = @transform_15, window_bounds = array<i64: 1, 32>}, {pipeline_mode = #tpu.pipeline_mode<synchronous>, transform_indices = @transform_16, window_bounds = array<i64: 32, 32>}, {pipeline_mode = #tpu.pipeline_mode<synchronous>, transform_indices = @transform_17, window_bounds = array<i64: 1, 32>}, {pipeline_mode = #tpu.pipeline_mode<synchronous>, transform_indices = @transform_18, window_bounds = array<i64: 32, 32>}, {pipeline_mode = #tpu.pipeline_mode<synchronous>, transform_indices = @transform_19, window_bounds = array<i64: 1, 32>}, {pipeline_mode = #tpu.pipeline_mode<synchronous>, transform_indices = @transform_20, window_bounds = array<i64: 1, 32>}, {pipeline_mode = #tpu.pipeline_mode<synchronous>, transform_indices = @transform_21, window_bounds = array<i64: 1, 32>}, {pipeline_mode = #tpu.pipeline_mode<synchronous>, transform_indices = @transform_22, window_bounds = array<i64: 1, 32>}, {pipeline_mode = #tpu.pipeline_mode<synchronous>, transform_indices = @transform_23, window_bounds = array<i64: 1, 32>}, {pipeline_mode = #tpu.pipeline_mode<synchronous>, transform_indices = @transform_24, window_bounds = array<i64: 32, 32>}, {pipeline_mode = #tpu.pipeline_mode<synchronous>, transform_indices = @transform_25, window_bounds = array<i64: 1, 32>}, {pipeline_mode = #tpu.pipeline_mode<synchronous>, transform_indices = @transform_26, window_bounds = array<i64: 32, 32>}, {pipeline_mode = #tpu.pipeline_mode<synchronous>, transform_indices = @transform_27, window_bounds = array<i64: 1, 32>}, {pipeline_mode = #tpu.pipeline_mode<synchronous>, transform_indices = @transform_28, window_bounds = array<i64: 32, 32>}, {pipeline_mode = #tpu.pipeline_mode<synchronous>, transform_indices = @transform_29, window_bounds = array<i64: 1, 32>}, {pipeline_mode = #tpu.pipeline_mode<synchronous>, transform_indices = @transform_30, window_bounds = array<i64: 32, 32>}, {pipeline_mode = #tpu.pipeline_mode<synchronous>, transform_indices = @transform_31, window_bounds = array<i64: 1, 32>}, {pipeline_mode = #tpu.pipeline_mode<synchronous>, transform_indices = @transform_32, window_bounds = array<i64: 32, 32>}, {pipeline_mode = #tpu.pipeline_mode<synchronous>, transform_indices = @transform_33, window_bounds = array<i64: 1, 32>}, {pipeline_mode = #tpu.pipeline_mode<synchronous>, transform_indices = @transform_34, window_bounds = array<i64: 32, 32>}, {pipeline_mode = #tpu.pipeline_mode<synchronous>, transform_indices = @transform_35, window_bounds = array<i64: 1, 32>}, {pipeline_mode = #tpu.pipeline_mode<synchronous>, transform_indices = @transform_36, window_bounds = array<i64: 1, 32>}, {pipeline_mode = #tpu.pipeline_mode<synchronous>, transform_indices = @transform_37, window_bounds = array<i64: 1, 32>}, {pipeline_mode = #tpu.pipeline_mode<synchronous>, transform_indices = @transform_38, window_bounds = array<i64: 1, 32>}, {pipeline_mode = #tpu.pipeline_mode<synchronous>, transform_indices = @transform_39, window_bounds = array<i64: 1, 32>}, {pipeline_mode = #tpu.pipeline_mode<synchronous>, transform_indices = @transform_40, window_bounds = array<i64: 32, 16>}, {pipeline_mode = #tpu.pipeline_mode<synchronous>, transform_indices = @transform_41, window_bounds = array<i64: 1, 16>}, {transform_indices = @transform_42, window_bounds = array<i64: 2, 8, 32>}, {transform_indices = @transform_43, window_bounds = array<i64: 2, 8, 16>}]} {
    %c0 = arith.constant 0 : index
    %c0_0 = arith.constant 0 : index
    %c0_1 = arith.constant 0 : index
    %0 = vector.load %arg1[%c0, %c0_0, %c0_1] : memref<2x8x16xf32, #tpu.memory_space<vmem>>, vector<2x8x16xf32>
    %1 = vector.shape_cast %0 : vector<2x8x16xf32> to vector<16x16xf32>
    %c0_2 = arith.constant 0 : index
    %c0_3 = arith.constant 0 : index
    %c0_4 = arith.constant 0 : index
    %2 = vector.load %arg2[%c0_2, %c0_3, %c0_4] : memref<2x1x8xf32, #tpu.memory_space<vmem>>, vector<2x1x8xf32>
    %c0_5 = arith.constant 0 : index
    %c0_6 = arith.constant 0 : index
    %3 = vector.load %arg3[%c0_5, %c0_6] : memref<16x32xf32, #tpu.memory_space<vmem>>, vector<16x32xf32>
    %c0_7 = arith.constant 0 : index
    %c0_8 = arith.constant 0 : index
    %4 = vector.load %arg4[%c0_7, %c0_8] : memref<1x32xf32, #tpu.memory_space<vmem>>, vector<1x32xf32>
    %c0_9 = arith.constant 0 : index
    %c0_10 = arith.constant 0 : index
    %5 = vector.load %arg5[%c0_9, %c0_10] : memref<32x32xf32, #tpu.memory_space<vmem>>, vector<32x32xf32>
    %c0_11 = arith.constant 0 : index
    %c0_12 = arith.constant 0 : index
    %6 = vector.load %arg6[%c0_11, %c0_12] : memref<1x32xf32, #tpu.memory_space<vmem>>, vector<1x32xf32>
    %c0_13 = arith.constant 0 : index
    %c0_14 = arith.constant 0 : index
    %7 = vector.load %arg7[%c0_13, %c0_14] : memref<32x32xf32, #tpu.memory_space<vmem>>, vector<32x32xf32>
    %c0_15 = arith.constant 0 : index
    %c0_16 = arith.constant 0 : index
    %8 = vector.load %arg8[%c0_15, %c0_16] : memref<1x32xf32, #tpu.memory_space<vmem>>, vector<1x32xf32>
    %cst = arith.constant dense<0.000000e+00> : vector<16x32xf32>
    %9 = tpu.matmul %1, %3, %cst {dimension_numbers = #tpu.dot_dimension_numbers<[1], [0], [0], [1], [0, 0, 1, 1], [], []>} : vector<16x16xf32>, vector<16x32xf32>, vector<16x32xf32> -> vector<16x32xf32>
    %10 = vector.broadcast %4 : vector<1x32xf32> to vector<16x32xf32>
    %11 = arith.addf %9, %10 : vector<16x32xf32>
    %cst_17 = arith.constant dense<0.000000e+00> : vector<16x32xf32>
    %12 = tpu.matmul %11, %5, %cst_17 {dimension_numbers = #tpu.dot_dimension_numbers<[1], [0], [0], [1], [0, 0, 1, 1], [], []>} : vector<16x32xf32>, vector<32x32xf32>, vector<16x32xf32> -> vector<16x32xf32>
    %13 = vector.broadcast %6 : vector<1x32xf32> to vector<16x32xf32>
    %14 = arith.addf %12, %13 : vector<16x32xf32>
    %cst_18 = arith.constant 0.000000e+00 : f32
    %15 = vector.broadcast %cst_18 : f32 to vector<16x32xf32>
    %16 = arith.maximumf %14, %15 : vector<16x32xf32>
    %cst_19 = arith.constant dense<0.000000e+00> : vector<16x32xf32>
    %17 = tpu.matmul %16, %7, %cst_19 {dimension_numbers = #tpu.dot_dimension_numbers<[1], [0], [0], [1], [0, 0, 1, 1], [], []>} : vector<16x32xf32>, vector<32x32xf32>, vector<16x32xf32> -> vector<16x32xf32>
    %18 = vector.broadcast %8 : vector<1x32xf32> to vector<16x32xf32>
    %19 = arith.addf %17, %18 : vector<16x32xf32>
    %c0_20 = arith.constant 0 : index
    %c0_21 = arith.constant 0 : index
    %20 = vector.load %arg9[%c0_20, %c0_21] : memref<32x32xf32, #tpu.memory_space<vmem>>, vector<32x32xf32>
    %c0_22 = arith.constant 0 : index
    %c0_23 = arith.constant 0 : index
    %21 = vector.load %arg10[%c0_22, %c0_23] : memref<1x32xf32, #tpu.memory_space<vmem>>, vector<1x32xf32>
    %c0_24 = arith.constant 0 : index
    %c0_25 = arith.constant 0 : index
    %22 = vector.load %arg11[%c0_24, %c0_25] : memref<32x32xf32, #tpu.memory_space<vmem>>, vector<32x32xf32>
    %c0_26 = arith.constant 0 : index
    %c0_27 = arith.constant 0 : index
    %23 = vector.load %arg12[%c0_26, %c0_27] : memref<1x32xf32, #tpu.memory_space<vmem>>, vector<1x32xf32>
    %c0_28 = arith.constant 0 : index
    %c0_29 = arith.constant 0 : index
    %24 = vector.load %arg13[%c0_28, %c0_29] : memref<32x32xf32, #tpu.memory_space<vmem>>, vector<32x32xf32>
    %c0_30 = arith.constant 0 : index
    %c0_31 = arith.constant 0 : index
    %25 = vector.load %arg14[%c0_30, %c0_31] : memref<1x32xf32, #tpu.memory_space<vmem>>, vector<1x32xf32>
    %c0_32 = arith.constant 0 : index
    %c0_33 = arith.constant 0 : index
    %26 = vector.load %arg15[%c0_32, %c0_33] : memref<32x32xf32, #tpu.memory_space<vmem>>, vector<32x32xf32>
    %c0_34 = arith.constant 0 : index
    %c0_35 = arith.constant 0 : index
    %27 = vector.load %arg16[%c0_34, %c0_35] : memref<1x32xf32, #tpu.memory_space<vmem>>, vector<1x32xf32>
    %c0_36 = arith.constant 0 : index
    %c0_37 = arith.constant 0 : index
    %28 = vector.load %arg17[%c0_36, %c0_37] : memref<32x32xf32, #tpu.memory_space<vmem>>, vector<32x32xf32>
    %c0_38 = arith.constant 0 : index
    %c0_39 = arith.constant 0 : index
    %29 = vector.load %arg18[%c0_38, %c0_39] : memref<1x32xf32, #tpu.memory_space<vmem>>, vector<1x32xf32>
    %c0_40 = arith.constant 0 : index
    %c0_41 = arith.constant 0 : index
    %30 = vector.load %arg19[%c0_40, %c0_41] : memref<32x32xf32, #tpu.memory_space<vmem>>, vector<32x32xf32>
    %c0_42 = arith.constant 0 : index
    %c0_43 = arith.constant 0 : index
    %31 = vector.load %arg20[%c0_42, %c0_43] : memref<1x32xf32, #tpu.memory_space<vmem>>, vector<1x32xf32>
    %c0_44 = arith.constant 0 : index
    %c0_45 = arith.constant 0 : index
    %32 = vector.load %arg21[%c0_44, %c0_45] : memref<1x32xf32, #tpu.memory_space<vmem>>, vector<1x32xf32>
    %c0_46 = arith.constant 0 : index
    %c0_47 = arith.constant 0 : index
    %33 = vector.load %arg22[%c0_46, %c0_47] : memref<1x32xf32, #tpu.memory_space<vmem>>, vector<1x32xf32>
    %c0_48 = arith.constant 0 : index
    %c0_49 = arith.constant 0 : index
    %34 = vector.load %arg23[%c0_48, %c0_49] : memref<1x32xf32, #tpu.memory_space<vmem>>, vector<1x32xf32>
    %c0_50 = arith.constant 0 : index
    %c0_51 = arith.constant 0 : index
    %35 = vector.load %arg24[%c0_50, %c0_51] : memref<1x32xf32, #tpu.memory_space<vmem>>, vector<1x32xf32>
    %cst_52 = arith.constant dense<0.000000e+00> : vector<16x32xf32>
    %36 = tpu.matmul %19, %20, %cst_52 {dimension_numbers = #tpu.dot_dimension_numbers<[1], [0], [0], [1], [0, 0, 1, 1], [], []>} : vector<16x32xf32>, vector<32x32xf32>, vector<16x32xf32> -> vector<16x32xf32>
    %37 = vector.broadcast %21 : vector<1x32xf32> to vector<16x32xf32>
    %38 = arith.addf %36, %37 : vector<16x32xf32>
    %cst_53 = arith.constant 0.176776692 : f32
    %39 = vector.broadcast %cst_53 : f32 to vector<16x32xf32>
    %40 = arith.mulf %38, %39 : vector<16x32xf32>
    %41 = vector.shape_cast %40 : vector<16x32xf32> to vector<2x8x32xf32>
    %cst_54 = arith.constant dense<0.000000e+00> : vector<16x32xf32>
    %42 = tpu.matmul %19, %22, %cst_54 {dimension_numbers = #tpu.dot_dimension_numbers<[1], [0], [0], [1], [0, 0, 1, 1], [], []>} : vector<16x32xf32>, vector<32x32xf32>, vector<16x32xf32> -> vector<16x32xf32>
    %43 = vector.broadcast %23 : vector<1x32xf32> to vector<16x32xf32>
    %44 = arith.addf %42, %43 : vector<16x32xf32>
    %45 = vector.shape_cast %44 : vector<16x32xf32> to vector<2x8x32xf32>
    %cst_55 = arith.constant dense<0.000000e+00> : vector<16x32xf32>
    %46 = tpu.matmul %19, %24, %cst_55 {dimension_numbers = #tpu.dot_dimension_numbers<[1], [0], [0], [1], [0, 0, 1, 1], [], []>} : vector<16x32xf32>, vector<32x32xf32>, vector<16x32xf32> -> vector<16x32xf32>
    %47 = vector.broadcast %25 : vector<1x32xf32> to vector<16x32xf32>
    %48 = arith.addf %46, %47 : vector<16x32xf32>
    %49 = vector.shape_cast %48 : vector<16x32xf32> to vector<2x8x32xf32>
    %cst_56 = arith.constant dense<0.000000e+00> : vector<2x8x8xf32>
    %50 = tpu.matmul %41, %45, %cst_56 {dimension_numbers = #tpu.dot_dimension_numbers<[2], [2], [1], [1], [0, 0, 0, 1, 1, 1], [0], [0]>} : vector<2x8x32xf32>, vector<2x8x32xf32>, vector<2x8x8xf32> -> vector<2x8x8xf32>
    %51 = vector.broadcast %2 : vector<2x1x8xf32> to vector<2x8x8xf32>
    %52 = arith.addf %50, %51 : vector<2x8x8xf32>
    %cst_57 = arith.constant dense<0xFF800000> : vector<2x8xf32>
    %53 = vector.multi_reduction <maximumf>, %52, %cst_57 [2] : vector<2x8x8xf32> to vector<2x8xf32>
    %54 = vector.shape_cast %53 : vector<2x8xf32> to vector<2x8x1xf32>
    %55 = vector.broadcast %54 : vector<2x8x1xf32> to vector<2x8x8xf32>
    %56 = arith.subf %52, %55 : vector<2x8x8xf32>
    %57 = math.exp %56 : vector<2x8x8xf32>
    %cst_58 = arith.constant dense<0.000000e+00> : vector<2x8xf32>
    %58 = vector.multi_reduction <add>, %57, %cst_58 [2] : vector<2x8x8xf32> to vector<2x8xf32>
    %59 = vector.shape_cast %58 : vector<2x8xf32> to vector<2x8x1xf32>
    %60 = tpu.reciprocal %59 {approx = true} : vector<2x8x1xf32> -> vector<2x8x1xf32>
    %61 = vector.broadcast %60 : vector<2x8x1xf32> to vector<2x8x8xf32>
    %62 = arith.mulf %57, %61 : vector<2x8x8xf32>
    %cst_59 = arith.constant dense<0.000000e+00> : vector<2x8x32xf32>
    %63 = tpu.matmul %62, %49, %cst_59 {dimension_numbers = #tpu.dot_dimension_numbers<[2], [1], [1], [2], [0, 0, 0, 1, 1, 2], [0], [0]>} : vector<2x8x8xf32>, vector<2x8x32xf32>, vector<2x8x32xf32> -> vector<2x8x32xf32>
    %64 = vector.shape_cast %63 : vector<2x8x32xf32> to vector<16x32xf32>
    %cst_60 = arith.constant dense<0.000000e+00> : vector<16x32xf32>
    %65 = tpu.matmul %64, %26, %cst_60 {dimension_numbers = #tpu.dot_dimension_numbers<[1], [0], [0], [1], [0, 0, 1, 1], [], []>} : vector<16x32xf32>, vector<32x32xf32>, vector<16x32xf32> -> vector<16x32xf32>
    %66 = vector.broadcast %27 : vector<1x32xf32> to vector<16x32xf32>
    %67 = arith.addf %65, %66 : vector<16x32xf32>
    %68 = arith.addf %19, %67 : vector<16x32xf32>
    %cst_61 = arith.constant dense<0.000000e+00> : vector<16xf32>
    %69 = vector.multi_reduction <add>, %68, %cst_61 [1] : vector<16x32xf32> to vector<16xf32>
    %70 = vector.shape_cast %69 : vector<16xf32> to vector<16x1xf32>
    %cst_62 = arith.constant 3.200000e+01 : f32
    %71 = vector.broadcast %cst_62 : f32 to vector<16x1xf32>
    %72 = arith.divf %70, %71 : vector<16x1xf32>
    %73 = vector.broadcast %72 : vector<16x1xf32> to vector<16x32xf32>
    %74 = arith.subf %68, %73 : vector<16x32xf32>
    %75 = arith.mulf %74, %74 : vector<16x32xf32>
    %cst_63 = arith.constant dense<0.000000e+00> : vector<16xf32>
    %76 = vector.multi_reduction <add>, %75, %cst_63 [1] : vector<16x32xf32> to vector<16xf32>
    %77 = vector.shape_cast %76 : vector<16xf32> to vector<16x1xf32>
    %cst_64 = arith.constant 3.200000e+01 : f32
    %78 = vector.broadcast %cst_64 : f32 to vector<16x1xf32>
    %79 = arith.divf %77, %78 : vector<16x1xf32>
    %cst_65 = arith.constant 9.99999974E-6 : f32
    %80 = vector.broadcast %cst_65 : f32 to vector<16x1xf32>
    %81 = arith.addf %79, %80 : vector<16x1xf32>
    %82 = math.rsqrt %81 : vector<16x1xf32>
    %83 = vector.broadcast %82 : vector<16x1xf32> to vector<16x32xf32>
    %84 = arith.mulf %74, %83 : vector<16x32xf32>
    %85 = vector.broadcast %32 : vector<1x32xf32> to vector<16x32xf32>
    %86 = arith.mulf %84, %85 : vector<16x32xf32>
    %87 = vector.broadcast %33 : vector<1x32xf32> to vector<16x32xf32>
    %88 = arith.addf %86, %87 : vector<16x32xf32>
    %cst_66 = arith.constant dense<0.000000e+00> : vector<16x32xf32>
    %89 = tpu.matmul %88, %28, %cst_66 {dimension_numbers = #tpu.dot_dimension_numbers<[1], [0], [0], [1], [0, 0, 1, 1], [], []>} : vector<16x32xf32>, vector<32x32xf32>, vector<16x32xf32> -> vector<16x32xf32>
    %90 = vector.broadcast %29 : vector<1x32xf32> to vector<16x32xf32>
    %91 = arith.addf %89, %90 : vector<16x32xf32>
    %cst_67 = arith.constant 0.000000e+00 : f32
    %92 = vector.broadcast %cst_67 : f32 to vector<16x32xf32>
    %93 = arith.maximumf %91, %92 : vector<16x32xf32>
    %cst_68 = arith.constant dense<0.000000e+00> : vector<16x32xf32>
    %94 = tpu.matmul %93, %30, %cst_68 {dimension_numbers = #tpu.dot_dimension_numbers<[1], [0], [0], [1], [0, 0, 1, 1], [], []>} : vector<16x32xf32>, vector<32x32xf32>, vector<16x32xf32> -> vector<16x32xf32>
    %95 = vector.broadcast %31 : vector<1x32xf32> to vector<16x32xf32>
    %96 = arith.addf %94, %95 : vector<16x32xf32>
    %97 = arith.addf %88, %96 : vector<16x32xf32>
    %cst_69 = arith.constant dense<0.000000e+00> : vector<16xf32>
    %98 = vector.multi_reduction <add>, %97, %cst_69 [1] : vector<16x32xf32> to vector<16xf32>
    %99 = vector.shape_cast %98 : vector<16xf32> to vector<16x1xf32>
    %cst_70 = arith.constant 3.200000e+01 : f32
    %100 = vector.broadcast %cst_70 : f32 to vector<16x1xf32>
    %101 = arith.divf %99, %100 : vector<16x1xf32>
    %102 = vector.broadcast %101 : vector<16x1xf32> to vector<16x32xf32>
    %103 = arith.subf %97, %102 : vector<16x32xf32>
    %104 = arith.mulf %103, %103 : vector<16x32xf32>
    %cst_71 = arith.constant dense<0.000000e+00> : vector<16xf32>
    %105 = vector.multi_reduction <add>, %104, %cst_71 [1] : vector<16x32xf32> to vector<16xf32>
    %106 = vector.shape_cast %105 : vector<16xf32> to vector<16x1xf32>
    %cst_72 = arith.constant 3.200000e+01 : f32
    %107 = vector.broadcast %cst_72 : f32 to vector<16x1xf32>
    %108 = arith.divf %106, %107 : vector<16x1xf32>
    %cst_73 = arith.constant 9.99999974E-6 : f32
    %109 = vector.broadcast %cst_73 : f32 to vector<16x1xf32>
    %110 = arith.addf %108, %109 : vector<16x1xf32>
    %111 = math.rsqrt %110 : vector<16x1xf32>
    %112 = vector.broadcast %111 : vector<16x1xf32> to vector<16x32xf32>
    %113 = arith.mulf %103, %112 : vector<16x32xf32>
    %114 = vector.broadcast %34 : vector<1x32xf32> to vector<16x32xf32>
    %115 = arith.mulf %113, %114 : vector<16x32xf32>
    %116 = vector.broadcast %35 : vector<1x32xf32> to vector<16x32xf32>
    %117 = arith.addf %115, %116 : vector<16x32xf32>
    %c0_74 = arith.constant 0 : index
    %c0_75 = arith.constant 0 : index
    %118 = vector.load %arg25[%c0_74, %c0_75] : memref<32x32xf32, #tpu.memory_space<vmem>>, vector<32x32xf32>
    %c0_76 = arith.constant 0 : index
    %c0_77 = arith.constant 0 : index
    %119 = vector.load %arg26[%c0_76, %c0_77] : memref<1x32xf32, #tpu.memory_space<vmem>>, vector<1x32xf32>
    %c0_78 = arith.constant 0 : index
    %c0_79 = arith.constant 0 : index
    %120 = vector.load %arg27[%c0_78, %c0_79] : memref<32x32xf32, #tpu.memory_space<vmem>>, vector<32x32xf32>
    %c0_80 = arith.constant 0 : index
    %c0_81 = arith.constant 0 : index
    %121 = vector.load %arg28[%c0_80, %c0_81] : memref<1x32xf32, #tpu.memory_space<vmem>>, vector<1x32xf32>
    %c0_82 = arith.constant 0 : index
    %c0_83 = arith.constant 0 : index
    %122 = vector.load %arg29[%c0_82, %c0_83] : memref<32x32xf32, #tpu.memory_space<vmem>>, vector<32x32xf32>
    %c0_84 = arith.constant 0 : index
    %c0_85 = arith.constant 0 : index
    %123 = vector.load %arg30[%c0_84, %c0_85] : memref<1x32xf32, #tpu.memory_space<vmem>>, vector<1x32xf32>
    %c0_86 = arith.constant 0 : index
    %c0_87 = arith.constant 0 : index
    %124 = vector.load %arg31[%c0_86, %c0_87] : memref<32x32xf32, #tpu.memory_space<vmem>>, vector<32x32xf32>
    %c0_88 = arith.constant 0 : index
    %c0_89 = arith.constant 0 : index
    %125 = vector.load %arg32[%c0_88, %c0_89] : memref<1x32xf32, #tpu.memory_space<vmem>>, vector<1x32xf32>
    %c0_90 = arith.constant 0 : index
    %c0_91 = arith.constant 0 : index
    %126 = vector.load %arg33[%c0_90, %c0_91] : memref<32x32xf32, #tpu.memory_space<vmem>>, vector<32x32xf32>
    %c0_92 = arith.constant 0 : index
    %c0_93 = arith.constant 0 : index
    %127 = vector.load %arg34[%c0_92, %c0_93] : memref<1x32xf32, #tpu.memory_space<vmem>>, vector<1x32xf32>
    %c0_94 = arith.constant 0 : index
    %c0_95 = arith.constant 0 : index
    %128 = vector.load %arg35[%c0_94, %c0_95] : memref<32x32xf32, #tpu.memory_space<vmem>>, vector<32x32xf32>
    %c0_96 = arith.constant 0 : index
    %c0_97 = arith.constant 0 : index
    %129 = vector.load %arg36[%c0_96, %c0_97] : memref<1x32xf32, #tpu.memory_space<vmem>>, vector<1x32xf32>
    %c0_98 = arith.constant 0 : index
    %c0_99 = arith.constant 0 : index
    %130 = vector.load %arg37[%c0_98, %c0_99] : memref<1x32xf32, #tpu.memory_space<vmem>>, vector<1x32xf32>
    %c0_100 = arith.constant 0 : index
    %c0_101 = arith.constant 0 : index
    %131 = vector.load %arg38[%c0_100, %c0_101] : memref<1x32xf32, #tpu.memory_space<vmem>>, vector<1x32xf32>
    %c0_102 = arith.constant 0 : index
    %c0_103 = arith.constant 0 : index
    %132 = vector.load %arg39[%c0_102, %c0_103] : memref<1x32xf32, #tpu.memory_space<vmem>>, vector<1x32xf32>
    %c0_104 = arith.constant 0 : index
    %c0_105 = arith.constant 0 : index
    %133 = vector.load %arg40[%c0_104, %c0_105] : memref<1x32xf32, #tpu.memory_space<vmem>>, vector<1x32xf32>
    %cst_106 = arith.constant dense<0.000000e+00> : vector<16x32xf32>
    %134 = tpu.matmul %117, %118, %cst_106 {dimension_numbers = #tpu.dot_dimension_numbers<[1], [0], [0], [1], [0, 0, 1, 1], [], []>} : vector<16x32xf32>, vector<32x32xf32>, vector<16x32xf32> -> vector<16x32xf32>
    %135 = vector.broadcast %119 : vector<1x32xf32> to vector<16x32xf32>
    %136 = arith.addf %134, %135 : vector<16x32xf32>
    %cst_107 = arith.constant 0.176776692 : f32
    %137 = vector.broadcast %cst_107 : f32 to vector<16x32xf32>
    %138 = arith.mulf %136, %137 : vector<16x32xf32>
    %139 = vector.shape_cast %138 : vector<16x32xf32> to vector<2x8x32xf32>
    %cst_108 = arith.constant dense<0.000000e+00> : vector<16x32xf32>
    %140 = tpu.matmul %117, %120, %cst_108 {dimension_numbers = #tpu.dot_dimension_numbers<[1], [0], [0], [1], [0, 0, 1, 1], [], []>} : vector<16x32xf32>, vector<32x32xf32>, vector<16x32xf32> -> vector<16x32xf32>
    %141 = vector.broadcast %121 : vector<1x32xf32> to vector<16x32xf32>
    %142 = arith.addf %140, %141 : vector<16x32xf32>
    %143 = vector.shape_cast %142 : vector<16x32xf32> to vector<2x8x32xf32>
    %cst_109 = arith.constant dense<0.000000e+00> : vector<16x32xf32>
    %144 = tpu.matmul %117, %122, %cst_109 {dimension_numbers = #tpu.dot_dimension_numbers<[1], [0], [0], [1], [0, 0, 1, 1], [], []>} : vector<16x32xf32>, vector<32x32xf32>, vector<16x32xf32> -> vector<16x32xf32>
    %145 = vector.broadcast %123 : vector<1x32xf32> to vector<16x32xf32>
    %146 = arith.addf %144, %145 : vector<16x32xf32>
    %147 = vector.shape_cast %146 : vector<16x32xf32> to vector<2x8x32xf32>
    %cst_110 = arith.constant dense<0.000000e+00> : vector<2x8x8xf32>
    %148 = tpu.matmul %139, %143, %cst_110 {dimension_numbers = #tpu.dot_dimension_numbers<[2], [2], [1], [1], [0, 0, 0, 1, 1, 1], [0], [0]>} : vector<2x8x32xf32>, vector<2x8x32xf32>, vector<2x8x8xf32> -> vector<2x8x8xf32>
    %149 = vector.broadcast %2 : vector<2x1x8xf32> to vector<2x8x8xf32>
    %150 = arith.addf %148, %149 : vector<2x8x8xf32>
    %cst_111 = arith.constant dense<0xFF800000> : vector<2x8xf32>
    %151 = vector.multi_reduction <maximumf>, %150, %cst_111 [2] : vector<2x8x8xf32> to vector<2x8xf32>
    %152 = vector.shape_cast %151 : vector<2x8xf32> to vector<2x8x1xf32>
    %153 = vector.broadcast %152 : vector<2x8x1xf32> to vector<2x8x8xf32>
    %154 = arith.subf %150, %153 : vector<2x8x8xf32>
    %155 = math.exp %154 : vector<2x8x8xf32>
    %cst_112 = arith.constant dense<0.000000e+00> : vector<2x8xf32>
    %156 = vector.multi_reduction <add>, %155, %cst_112 [2] : vector<2x8x8xf32> to vector<2x8xf32>
    %157 = vector.shape_cast %156 : vector<2x8xf32> to vector<2x8x1xf32>
    %158 = tpu.reciprocal %157 {approx = true} : vector<2x8x1xf32> -> vector<2x8x1xf32>
    %159 = vector.broadcast %158 : vector<2x8x1xf32> to vector<2x8x8xf32>
    %160 = arith.mulf %155, %159 : vector<2x8x8xf32>
    %cst_113 = arith.constant dense<0.000000e+00> : vector<2x8x32xf32>
    %161 = tpu.matmul %160, %147, %cst_113 {dimension_numbers = #tpu.dot_dimension_numbers<[2], [1], [1], [2], [0, 0, 0, 1, 1, 2], [0], [0]>} : vector<2x8x8xf32>, vector<2x8x32xf32>, vector<2x8x32xf32> -> vector<2x8x32xf32>
    %162 = vector.shape_cast %161 : vector<2x8x32xf32> to vector<16x32xf32>
    %cst_114 = arith.constant dense<0.000000e+00> : vector<16x32xf32>
    %163 = tpu.matmul %162, %124, %cst_114 {dimension_numbers = #tpu.dot_dimension_numbers<[1], [0], [0], [1], [0, 0, 1, 1], [], []>} : vector<16x32xf32>, vector<32x32xf32>, vector<16x32xf32> -> vector<16x32xf32>
    %164 = vector.broadcast %125 : vector<1x32xf32> to vector<16x32xf32>
    %165 = arith.addf %163, %164 : vector<16x32xf32>
    %166 = arith.addf %117, %165 : vector<16x32xf32>
    %cst_115 = arith.constant dense<0.000000e+00> : vector<16xf32>
    %167 = vector.multi_reduction <add>, %166, %cst_115 [1] : vector<16x32xf32> to vector<16xf32>
    %168 = vector.shape_cast %167 : vector<16xf32> to vector<16x1xf32>
    %cst_116 = arith.constant 3.200000e+01 : f32
    %169 = vector.broadcast %cst_116 : f32 to vector<16x1xf32>
    %170 = arith.divf %168, %169 : vector<16x1xf32>
    %171 = vector.broadcast %170 : vector<16x1xf32> to vector<16x32xf32>
    %172 = arith.subf %166, %171 : vector<16x32xf32>
    %173 = arith.mulf %172, %172 : vector<16x32xf32>
    %cst_117 = arith.constant dense<0.000000e+00> : vector<16xf32>
    %174 = vector.multi_reduction <add>, %173, %cst_117 [1] : vector<16x32xf32> to vector<16xf32>
    %175 = vector.shape_cast %174 : vector<16xf32> to vector<16x1xf32>
    %cst_118 = arith.constant 3.200000e+01 : f32
    %176 = vector.broadcast %cst_118 : f32 to vector<16x1xf32>
    %177 = arith.divf %175, %176 : vector<16x1xf32>
    %cst_119 = arith.constant 9.99999974E-6 : f32
    %178 = vector.broadcast %cst_119 : f32 to vector<16x1xf32>
    %179 = arith.addf %177, %178 : vector<16x1xf32>
    %180 = math.rsqrt %179 : vector<16x1xf32>
    %181 = vector.broadcast %180 : vector<16x1xf32> to vector<16x32xf32>
    %182 = arith.mulf %172, %181 : vector<16x32xf32>
    %183 = vector.broadcast %130 : vector<1x32xf32> to vector<16x32xf32>
    %184 = arith.mulf %182, %183 : vector<16x32xf32>
    %185 = vector.broadcast %131 : vector<1x32xf32> to vector<16x32xf32>
    %186 = arith.addf %184, %185 : vector<16x32xf32>
    %cst_120 = arith.constant dense<0.000000e+00> : vector<16x32xf32>
    %187 = tpu.matmul %186, %126, %cst_120 {dimension_numbers = #tpu.dot_dimension_numbers<[1], [0], [0], [1], [0, 0, 1, 1], [], []>} : vector<16x32xf32>, vector<32x32xf32>, vector<16x32xf32> -> vector<16x32xf32>
    %188 = vector.broadcast %127 : vector<1x32xf32> to vector<16x32xf32>
    %189 = arith.addf %187, %188 : vector<16x32xf32>
    %cst_121 = arith.constant 0.000000e+00 : f32
    %190 = vector.broadcast %cst_121 : f32 to vector<16x32xf32>
    %191 = arith.maximumf %189, %190 : vector<16x32xf32>
    %cst_122 = arith.constant dense<0.000000e+00> : vector<16x32xf32>
    %192 = tpu.matmul %191, %128, %cst_122 {dimension_numbers = #tpu.dot_dimension_numbers<[1], [0], [0], [1], [0, 0, 1, 1], [], []>} : vector<16x32xf32>, vector<32x32xf32>, vector<16x32xf32> -> vector<16x32xf32>
    %193 = vector.broadcast %129 : vector<1x32xf32> to vector<16x32xf32>
    %194 = arith.addf %192, %193 : vector<16x32xf32>
    %195 = arith.addf %186, %194 : vector<16x32xf32>
    %cst_123 = arith.constant dense<0.000000e+00> : vector<16xf32>
    %196 = vector.multi_reduction <add>, %195, %cst_123 [1] : vector<16x32xf32> to vector<16xf32>
    %197 = vector.shape_cast %196 : vector<16xf32> to vector<16x1xf32>
    %cst_124 = arith.constant 3.200000e+01 : f32
    %198 = vector.broadcast %cst_124 : f32 to vector<16x1xf32>
    %199 = arith.divf %197, %198 : vector<16x1xf32>
    %200 = vector.broadcast %199 : vector<16x1xf32> to vector<16x32xf32>
    %201 = arith.subf %195, %200 : vector<16x32xf32>
    %202 = arith.mulf %201, %201 : vector<16x32xf32>
    %cst_125 = arith.constant dense<0.000000e+00> : vector<16xf32>
    %203 = vector.multi_reduction <add>, %202, %cst_125 [1] : vector<16x32xf32> to vector<16xf32>
    %204 = vector.shape_cast %203 : vector<16xf32> to vector<16x1xf32>
    %cst_126 = arith.constant 3.200000e+01 : f32
    %205 = vector.broadcast %cst_126 : f32 to vector<16x1xf32>
    %206 = arith.divf %204, %205 : vector<16x1xf32>
    %cst_127 = arith.constant 9.99999974E-6 : f32
    %207 = vector.broadcast %cst_127 : f32 to vector<16x1xf32>
    %208 = arith.addf %206, %207 : vector<16x1xf32>
    %209 = math.rsqrt %208 : vector<16x1xf32>
    %210 = vector.broadcast %209 : vector<16x1xf32> to vector<16x32xf32>
    %211 = arith.mulf %201, %210 : vector<16x32xf32>
    %212 = vector.broadcast %132 : vector<1x32xf32> to vector<16x32xf32>
    %213 = arith.mulf %211, %212 : vector<16x32xf32>
    %214 = vector.broadcast %133 : vector<1x32xf32> to vector<16x32xf32>
    %215 = arith.addf %213, %214 : vector<16x32xf32>
    %c0_128 = arith.constant 0 : index
    %c0_129 = arith.constant 0 : index
    %216 = vector.load %arg41[%c0_128, %c0_129] : memref<32x16xf32, #tpu.memory_space<vmem>>, vector<32x16xf32>
    %c0_130 = arith.constant 0 : index
    %c0_131 = arith.constant 0 : index
    %217 = vector.load %arg42[%c0_130, %c0_131] : memref<1x16xf32, #tpu.memory_space<vmem>>, vector<1x16xf32>
    %218 = vector.shape_cast %215 : vector<16x32xf32> to vector<2x8x32xf32>
    %c0_132 = arith.constant 0 : index
    %c0_133 = arith.constant 0 : index
    %c0_134 = arith.constant 0 : index
    %219 = vector.load %arg43[%c0_132, %c0_133, %c0_134] : memref<2x8x32xf32, #tpu.memory_space<vmem>>, vector<2x8x32xf32>
    tpu.vector_store %arg43[%c0_132, %c0_133, %c0_134], %218 {strides = array<i32>} : memref<2x8x32xf32, #tpu.memory_space<vmem>>, vector<2x8x32xf32>,
    %cst_135 = arith.constant dense<0.000000e+00> : vector<16x16xf32>
    %220 = tpu.matmul %215, %216, %cst_135 {dimension_numbers = #tpu.dot_dimension_numbers<[1], [0], [0], [1], [0, 0, 1, 1], [], []>} : vector<16x32xf32>, vector<32x16xf32>, vector<16x16xf32> -> vector<16x16xf32>
    %221 = vector.broadcast %217 : vector<1x16xf32> to vector<16x16xf32>
    %222 = arith.addf %220, %221 : vector<16x16xf32>
    %223 = vector.shape_cast %222 : vector<16x16xf32> to vector<2x8x16xf32>
    %c0_136 = arith.constant 0 : index
    %c0_137 = arith.constant 0 : index
    %c0_138 = arith.constant 0 : index
    %224 = vector.load %arg44[%c0_136, %c0_137, %c0_138] : memref<2x8x16xf32, #tpu.memory_space<vmem>>, vector<2x8x16xf32>
    tpu.vector_store %arg44[%c0_136, %c0_137, %c0_138], %223 {strides = array<i32>} : memref<2x8x16xf32, #tpu.memory_space<vmem>>, vector<2x8x16xf32>,
    return
  }
  func.func @transform_0(%arg0: i32) -> (i32, i32, i32) {
    %c0_i32 = arith.constant 0 : i32
    %c0_i32_0 = arith.constant 0 : i32
    %c0_i32_1 = arith.constant 0 : i32
    return %arg0, %c0_i32, %c0_i32_0 : i32, i32, i32
  }
  func.func @transform_1(%arg0: i32) -> (i32, i32, i32) {
    %c0_i32 = arith.constant 0 : i32
    %c0_i32_0 = arith.constant 0 : i32
    %c0_i32_1 = arith.constant 0 : i32
    return %arg0, %c0_i32, %c0_i32_0 : i32, i32, i32
  }
  func.func @transform_2(%arg0: i32) -> (i32, i32) {
    %c0_i32 = arith.constant 0 : i32
    %c0_i32_0 = arith.constant 0 : i32
    %c0_i32_1 = arith.constant 0 : i32
    return %c0_i32, %c0_i32_0 : i32, i32
  }
  func.func @transform_3(%arg0: i32) -> (i32, i32) {
    %c0_i32 = arith.constant 0 : i32
    %c0_i32_0 = arith.constant 0 : i32
    %c0_i32_1 = arith.constant 0 : i32
    return %c0_i32, %c0_i32_0 : i32, i32
  }
  func.func @transform_4(%arg0: i32) -> (i32, i32) {
    %c0_i32 = arith.constant 0 : i32
    %c0_i32_0 = arith.constant 0 : i32
    %c0_i32_1 = arith.constant 0 : i32
    return %c0_i32, %c0_i32_0 : i32, i32
  }
  func.func @transform_5(%arg0: i32) -> (i32, i32) {
    %c0_i32 = arith.constant 0 : i32
    %c0_i32_0 = arith.constant 0 : i32
    %c0_i32_1 = arith.constant 0 : i32
    return %c0_i32, %c0_i32_0 : i32, i32
  }
  func.func @transform_6(%arg0: i32) -> (i32, i32) {
    %c0_i32 = arith.constant 0 : i32
    %c0_i32_0 = arith.constant 0 : i32
    %c0_i32_1 = arith.constant 0 : i32
    return %c0_i32, %c0_i32_0 : i32, i32
  }
  func.func @transform_7(%arg0: i32) -> (i32, i32) {
    %c0_i32 = arith.constant 0 : i32
    %c0_i32_0 = arith.constant 0 : i32
    %c0_i32_1 = arith.constant 0 : i32
    return %c0_i32, %c0_i32_0 : i32, i32
  }
  func.func @transform_8(%arg0: i32) -> (i32, i32) {
    %c0_i32 = arith.constant 0 : i32
    %c0_i32_0 = arith.constant 0 : i32
    %c0_i32_1 = arith.constant 0 : i32
    return %c0_i32, %c0_i32_0 : i32, i32
  }
  func.func @transform_9(%arg0: i32) -> (i32, i32) {
    %c0_i32 = arith.constant 0 : i32
    %c0_i32_0 = arith.constant 0 : i32
    %c0_i32_1 = arith.constant 0 : i32
    return %c0_i32, %c0_i32_0 : i32, i32
  }
  func.func @transform_10(%arg0: i32) -> (i32, i32) {
    %c0_i32 = arith.constant 0 : i32
    %c0_i32_0 = arith.constant 0 : i32
    %c0_i32_1 = arith.constant 0 : i32
    return %c0_i32, %c0_i32_0 : i32, i32
  }
  func.func @transform_11(%arg0: i32) -> (i32, i32) {
    %c0_i32 = arith.constant 0 : i32
    %c0_i32_0 = arith.constant 0 : i32
    %c0_i32_1 = arith.constant 0 : i32
    return %c0_i32, %c0_i32_0 : i32, i32
  }
  func.func @transform_12(%arg0: i32) -> (i32, i32) {
    %c0_i32 = arith.constant 0 : i32
    %c0_i32_0 = arith.constant 0 : i32
    %c0_i32_1 = arith.constant 0 : i32
    return %c0_i32, %c0_i32_0 : i32, i32
  }
  func.func @transform_13(%arg0: i32) -> (i32, i32) {
    %c0_i32 = arith.constant 0 : i32
    %c0_i32_0 = arith.constant 0 : i32
    %c0_i32_1 = arith.constant 0 : i32
    return %c0_i32, %c0_i32_0 : i32, i32
  }
  func.func @transform_14(%arg0: i32) -> (i32, i32) {
    %c0_i32 = arith.constant 0 : i32
    %c0_i32_0 = arith.constant 0 : i32
    %c0_i32_1 = arith.constant 0 : i32
    return %c0_i32, %c0_i32_0 : i32, i32
  }
  func.func @transform_15(%arg0: i32) -> (i32, i32) {
    %c0_i32 = arith.constant 0 : i32
    %c0_i32_0 = arith.constant 0 : i32
    %c0_i32_1 = arith.constant 0 : i32
    return %c0_i32, %c0_i32_0 : i32, i32
  }
  func.func @transform_16(%arg0: i32) -> (i32, i32) {
    %c0_i32 = arith.constant 0 : i32
    %c0_i32_0 = arith.constant 0 : i32
    %c0_i32_1 = arith.constant 0 : i32
    return %c0_i32, %c0_i32_0 : i32, i32
  }
  func.func @transform_17(%arg0: i32) -> (i32, i32) {
    %c0_i32 = arith.constant 0 : i32
    %c0_i32_0 = arith.constant 0 : i32
    %c0_i32_1 = arith.constant 0 : i32
    return %c0_i32, %c0_i32_0 : i32, i32
  }
  func.func @transform_18(%arg0: i32) -> (i32, i32) {
    %c0_i32 = arith.constant 0 : i32
    %c0_i32_0 = arith.constant 0 : i32
    %c0_i32_1 = arith.constant 0 : i32
    return %c0_i32, %c0_i32_0 : i32, i32
  }
  func.func @transform_19(%arg0: i32) -> (i32, i32) {
    %c0_i32 = arith.constant 0 : i32
    %c0_i32_0 = arith.constant 0 : i32
    %c0_i32_1 = arith.constant 0 : i32
    return %c0_i32, %c0_i32_0 : i32, i32
  }
  func.func @transform_20(%arg0: i32) -> (i32, i32) {
    %c0_i32 = arith.constant 0 : i32
    %c0_i32_0 = arith.constant 0 : i32
    %c0_i32_1 = arith.constant 0 : i32
    return %c0_i32, %c0_i32_0 : i32, i32
  }
  func.func @transform_21(%arg0: i32) -> (i32, i32) {
    %c0_i32 = arith.constant 0 : i32
    %c0_i32_0 = arith.constant 0 : i32
    %c0_i32_1 = arith.constant 0 : i32
    return %c0_i32, %c0_i32_0 : i32, i32
  }
  func.func @transform_22(%arg0: i32) -> (i32, i32) {
    %c0_i32 = arith.constant 0 : i32
    %c0_i32_0 = arith.constant 0 : i32
    %c0_i32_1 = arith.constant 0 : i32
    return %c0_i32, %c0_i32_0 : i32, i32
  }
  func.func @transform_23(%arg0: i32) -> (i32, i32) {
    %c0_i32 = arith.constant 0 : i32
    %c0_i32_0 = arith.constant 0 : i32
    %c0_i32_1 = arith.constant 0 : i32
    return %c0_i32, %c0_i32_0 : i32, i32
  }
  func.func @transform_24(%arg0: i32) -> (i32, i32) {
    %c0_i32 = arith.constant 0 : i32
    %c0_i32_0 = arith.constant 0 : i32
    %c0_i32_1 = arith.constant 0 : i32
    return %c0_i32, %c0_i32_0 : i32, i32
  }
  func.func @transform_25(%arg0: i32) -> (i32, i32) {
    %c0_i32 = arith.constant 0 : i32
    %c0_i32_0 = arith.constant 0 : i32
    %c0_i32_1 = arith.constant 0 : i32
    return %c0_i32, %c0_i32_0 : i32, i32
  }
  func.func @transform_26(%arg0: i32) -> (i32, i32) {
    %c0_i32 = arith.constant 0 : i32
    %c0_i32_0 = arith.constant 0 : i32
    %c0_i32_1 = arith.constant 0 : i32
    return %c0_i32, %c0_i32_0 : i32, i32
  }
  func.func @transform_27(%arg0: i32) -> (i32, i32) {
    %c0_i32 = arith.constant 0 : i32
    %c0_i32_0 = arith.constant 0 : i32
    %c0_i32_1 = arith.constant 0 : i32
    return %c0_i32, %c0_i32_0 : i32, i32
  }
  func.func @transform_28(%arg0: i32) -> (i32, i32) {
    %c0_i32 = arith.constant 0 : i32
    %c0_i32_0 = arith.constant 0 : i32
    %c0_i32_1 = arith.constant 0 : i32
    return %c0_i32, %c0_i32_0 : i32, i32
  }
  func.func @transform_29(%arg0: i32) -> (i32, i32) {
    %c0_i32 = arith.constant 0 : i32
    %c0_i32_0 = arith.constant 0 : i32
    %c0_i32_1 = arith.constant 0 : i32
    return %c0_i32, %c0_i32_0 : i32, i32
  }
  func.func @transform_30(%arg0: i32) -> (i32, i32) {
    %c0_i32 = arith.constant 0 : i32
    %c0_i32_0 = arith.constant 0 : i32
    %c0_i32_1 = arith.constant 0 : i32
    return %c0_i32, %c0_i32_0 : i32, i32
  }
  func.func @transform_31(%arg0: i32) -> (i32, i32) {
    %c0_i32 = arith.constant 0 : i32
    %c0_i32_0 = arith.constant 0 : i32
    %c0_i32_1 = arith.constant 0 : i32
    return %c0_i32, %c0_i32_0 : i32, i32
  }
  func.func @transform_32(%arg0: i32) -> (i32, i32) {
    %c0_i32 = arith.constant 0 : i32
    %c0_i32_0 = arith.constant 0 : i32
    %c0_i32_1 = arith.constant 0 : i32
    return %c0_i32, %c0_i32_0 : i32, i32
  }
  func.func @transform_33(%arg0: i32) -> (i32, i32) {
    %c0_i32 = arith.constant 0 : i32
    %c0_i32_0 = arith.constant 0 : i32
    %c0_i32_1 = arith.constant 0 : i32
    return %c0_i32, %c0_i32_0 : i32, i32
  }
  func.func @transform_34(%arg0: i32) -> (i32, i32) {
    %c0_i32 = arith.constant 0 : i32
    %c0_i32_0 = arith.constant 0 : i32
    %c0_i32_1 = arith.constant 0 : i32
    return %c0_i32, %c0_i32_0 : i32, i32
  }
  func.func @transform_35(%arg0: i32) -> (i32, i32) {
    %c0_i32 = arith.constant 0 : i32
    %c0_i32_0 = arith.constant 0 : i32
    %c0_i32_1 = arith.constant 0 : i32
    return %c0_i32, %c0_i32_0 : i32, i32
  }
  func.func @transform_36(%arg0: i32) -> (i32, i32) {
    %c0_i32 = arith.constant 0 : i32
    %c0_i32_0 = arith.constant 0 : i32
    %c0_i32_1 = arith.constant 0 : i32
    return %c0_i32, %c0_i32_0 : i32, i32
  }
  func.func @transform_37(%arg0: i32) -> (i32, i32) {
    %c0_i32 = arith.constant 0 : i32
    %c0_i32_0 = arith.constant 0 : i32
    %c0_i32_1 = arith.constant 0 : i32
    return %c0_i32, %c0_i32_0 : i32, i32
  }
  func.func @transform_38(%arg0: i32) -> (i32, i32) {
    %c0_i32 = arith.constant 0 : i32
    %c0_i32_0 = arith.constant 0 : i32
    %c0_i32_1 = arith.constant 0 : i32
    return %c0_i32, %c0_i32_0 : i32, i32
  }
  func.func @transform_39(%arg0: i32) -> (i32, i32) {
    %c0_i32 = arith.constant 0 : i32
    %c0_i32_0 = arith.constant 0 : i32
    %c0_i32_1 = arith.constant 0 : i32
    return %c0_i32, %c0_i32_0 : i32, i32
  }
  func.func @transform_40(%arg0: i32) -> (i32, i32) {
    %c0_i32 = arith.constant 0 : i32
    %c0_i32_0 = arith.constant 0 : i32
    %c0_i32_1 = arith.constant 0 : i32
    return %c0_i32, %c0_i32_0 : i32, i32
  }
  func.func @transform_41(%arg0: i32) -> (i32, i32) {
    %c0_i32 = arith.constant 0 : i32
    %c0_i32_0 = arith.constant 0 : i32
    %c0_i32_1 = arith.constant 0 : i32
    return %c0_i32, %c0_i32_0 : i32, i32
  }
  func.func @transform_42(%arg0: i32) -> (i32, i32, i32) {
    %c0_i32 = arith.constant 0 : i32
    %c0_i32_0 = arith.constant 0 : i32
    %c0_i32_1 = arith.constant 0 : i32
    return %arg0, %c0_i32, %c0_i32_0 : i32, i32, i32
  }
  func.func @transform_43(%arg0: i32) -> (i32, i32, i32) {
    %c0_i32 = arith.constant 0 : i32
    %c0_i32_0 = arith.constant 0 : i32
    %c0_i32_1 = arith.constant 0 : i32
    return %arg0, %c0_i32, %c0_i32_0 : i32, i32, i32
  }
}

</mosaic_0001>

<bundles_post_ra>
// kernel: tpu_custom_call.1
= control target key start
LH: loop header
LB: loop body
LE: loop exit
PB: predicated region body
PF: predicated region fallthrough
CT: control target
= control target key end

     0   :  { %s4229_s6 = smov 1   ;;  %s4230_s10 = smov 2   ;;  %s4767_s0 = inlined_call_operand.smem [shape: u32[44], index: -1, kind: input, shape index: {}] }
   0x1   :  { %s4321_s5 = sld [smem:[%s4767_s0]]   ;;  %s4231_s14 = smov 3  }
   0x2   :  { %s4326_s9 = sld [smem:[%s4767_s0 + %s4229_s6]]   ;;  %s4232_s18 = smov 4  }
   0x3   :  { %s4331_s13 = sld [smem:[%s4767_s0 + %s4230_s10]]   ;;  %s4233_s22 = smov 5  }
   0x4   :  { %s4336_s17 = sld [smem:[%s4767_s0 + %s4231_s14]]   ;;  %s4234_s26 = smov 6  }
   0x5   :  { %s4341_s21 = sld [smem:[%s4767_s0 + %s4232_s18]]   ;;  %s4235_s30 = smov 7  }
   0x6   :  { %s4346_s25 = sld [smem:[%s4767_s0 + %s4233_s22]]   ;;  %s4236_s4 = smov 8  }
   0x7   :  { %4771 = sst [smem:[#allocation75_spill]] %s4321_s5  ;;  %s4237_s10 = smov 9  }
   0x8   :  { %s4351_s29 = sld [smem:[%s4767_s0 + %s4234_s26]]   ;;  %s4238_s15 = smov 10  }
   0x9   :  { %4772 = sst [smem:[#allocation76_spill]] %s4331_s13  ;;  %s4239_s20 = smov 11  }
   0xa   :  { %s4356_s3 = sld [smem:[%s4767_s0 + %s4235_s30]]   ;;  %s4240_s26 = smov 12  }
   0xb   :  { %4773 = sst [smem:[#allocation77_spill]] %s4341_s21  ;;  %s4241_s1 = smov 13  }
   0xc   :  { %4774 = sst [smem:[#allocation78_spill]] %s4346_s25  ;;  %s4242_s7 = smov 14  }
   0xd   :  { %s4361_s8 = sld [smem:[%s4767_s0 + %s4236_s4]]   ;;  %s4244_s22 = smov 16  }
   0xe   :  { %s4366_s14 = sld [smem:[%s4767_s0 + %s4237_s10]]   ;;  %s4245_s28 = smov 17  }
   0xf   :  { %s4371_s19 = sld [smem:[%s4767_s0 + %s4238_s15]]   ;;  %s4243_s15 = smov 15  }
  0x10   :  { %4775 = sst [smem:[#allocation79_spill]] %s4356_s3 }
  0x11   :  { %s4376_s24 = sld [smem:[%s4767_s0 + %s4239_s20]]  }
  0x12   :  { %s4381_s30 = sld [smem:[%s4767_s0 + %s4240_s26]]  }
  0x13   :  { %s4386_s6 = sld [smem:[%s4767_s0 + %s4241_s1]]  }
  0x14   :  { %4776 = sst [smem:[#allocation80_spill]] %s4366_s14 }
  0x15   :  { %4777 = sst [smem:[#allocation81_spill]] %s4371_s19 }
  0x16   :  { %s4391_s12 = sld [smem:[%s4767_s0 + %s4242_s7]]   ;;  %s4246_s7 = smov 18  }
  0x17   :  { %4778 = sst [smem:[#allocation82_spill]] %s4376_s24 }
  0x18   :  { %s4396_s20 = sld [smem:[%s4767_s0 + %s4243_s15]]   ;;  %s4247_s15 = smov 19  }
  0x19   :  { %4779 = sst [smem:[#allocation83_spill]] %s4386_s6 }
  0x1a   :  { %s4401_s27 = sld [smem:[%s4767_s0 + %s4244_s22]]   ;;  %s4248_s22 = smov 20  }
  0x1b   :  { %s4406_s4 = sld [smem:[%s4767_s0 + %s4245_s28]]   ;;  %s4249_s28 = smov 21  }
  0x1c   :  { %s4411_s24 = sld [smem:[%s4767_s0 + %s4246_s7]]   ;;  %s4250_s7 = smov 22  }
  0x1d   :  { %s4416_s19 = sld [smem:[%s4767_s0 + %s4247_s15]]   ;;  %s4251_s15 = smov 23  }
  0x1e   :  { %4780 = sst [smem:[#allocation84_spill]] %s4396_s20 }
  0x1f   :  { %s4421_s21 = sld [smem:[%s4767_s0 + %s4248_s22]]   ;;  %s4252_s22 = smov 24  }
  0x20   :  { %s4431_s20 = sld [smem:[%s4767_s0 + %s4250_s7]]   ;;  %s4254_s7 = smov 26  }
  0x21   :  { %4781 = sst [smem:[#allocation85_spill]] %s4406_s4 }
  0x22   :  { %s4426_s4 = sld [smem:[%s4767_s0 + %s4249_s28]]   ;;  %s4253_s28 = smov 25  }
  0x23   :  { %4782 = sst [smem:[#allocation86_spill]] %s4416_s19 }
  0x24   :  { %s4436_s19 = sld [smem:[%s4767_s0 + %s4251_s15]]   ;;  %s4255_s15 = smov 27  }
  0x25   :  { %s4441_s6 = sld [smem:[%s4767_s0 + %s4252_s22]]   ;;  %s4256_s22 = smov 28  }
  0x26   :  { %s4451_s14 = sld [smem:[%s4767_s0 + %s4254_s7]]   ;;  %s4258_s7 = smov 30  }
  0x27   :  { %s4461_s3 = sld [smem:[%s4767_s0 + %s4256_s22]]   ;;  %s4260_s22 = smov 32  }
  0x28   :  { %4783 = sst [smem:[#allocation87_spill]] %s4426_s4 }
  0x29   :  { %s4446_s4 = sld [smem:[%s4767_s0 + %s4253_s28]]   ;;  %s4257_s28 = smov 29  }
  0x2a   :  { %4784 = sst [smem:[#allocation88_spill]] %s4436_s19 }
  0x2b   :  { %s4456_s19 = sld [smem:[%s4767_s0 + %s4255_s15]]   ;;  %s4259_s15 = smov 31  }
  0x2c   :  { %s4471_s25 = sld [smem:[%s4767_s0 + %s4258_s7]]   ;;  %s4262_s7 = smov 34  }
  0x2d   :  { %4787 = sst [smem:[#allocation91_spill]] %s4461_s3 }
  0x2e   :  { %s4481_s3 = sld [smem:[%s4767_s0 + %s4260_s22]]   ;;  %s4264_s22 = smov 36  }
  0x2f   :  { %4785 = sst [smem:[#allocation89_spill]] %s4446_s4 }
  0x30   :  { %s4466_s4 = sld [smem:[%s4767_s0 + %s4257_s28]]   ;;  %s4261_s28 = smov 33  }
  0x31   :  { %4786 = sst [smem:[#allocation90_spill]] %s4456_s19 }
  0x32   :  { %4788 = sst [smem:[#allocation92_spill]] %s4471_s25 }
  0x33   :  { %s4476_s19 = sld [smem:[%s4767_s0 + %s4259_s15]]   ;;  %s4263_s15 = smov 35  }
  0x34   :  { %4789 = sst [smem:[#allocation93_spill]] %s4481_s3 }
  0x35   :  { %s4486_s13 = sld [smem:[%s4767_s0 + %s4261_s28]]   ;;  %s4265_s28 = smov 37  }
  0x36   :  { %s4491_s25 = sld [smem:[%s4767_s0 + %s4262_s7]]   ;;  %s4266_s7 = smov 38  }
  0x37   :  { %s4496_s5 = sld [smem:[%s4767_s0 + %s4263_s15]]   ;;  %s4267_s15 = smov 39  }
  0x38   :  { %s4501_s3 = sld [smem:[%s4767_s0 + %s4264_s22]]   ;;  %s4268_s22 = smov 40  }
  0x3b   :  { %4790 = sst [smem:[#allocation94_spill]] %s4486_s13 }
  0x3c   :  { %4791 = sst [smem:[#allocation95_spill]] %s4491_s25 }
  0x3d   :  { %4792 = sst [smem:[#allocation96_spill]] %s4496_s5 }
  0x3e   :  { %4793 = sst [smem:[#allocation97_spill]] %s4501_s3 }
  0x3f   :  { %s4506_s13 = sld [smem:[%s4767_s0 + %s4265_s28]]   ;;  %s4269_s28 = smov 41  }
  0x40   :  { %s4511_s25 = sld [smem:[%s4767_s0 + %s4266_s7]]   ;;  %s4270_s7 = smov 42  }
  0x41   :  { %s4516_s5 = sld [smem:[%s4767_s0 + %s4267_s15]]   ;;  %s4271_s15 = smov 43  }
  0x42   :  { %s4521_s3 = sld [smem:[%s4767_s0 + %s4268_s22]]  }
  0x45   :  { %4794 = sst [smem:[#allocation98_spill]] %s4506_s13 }
  0x46   :  { %4795 = sst [smem:[#allocation99_spill]] %s4511_s25 }
  0x47   :  { %4796 = sst [smem:[#allocation100_spill]] %s4516_s5 }
  0x48   :  { %s4526_s13 = sld [smem:[%s4767_s0 + %s4269_s28]]  }
  0x49   :  { %s4531_s25 = sld [smem:[%s4767_s0 + %s4270_s7]]  }
  0x4a   :  { %s4536_s5 = sld [smem:[%s4767_s0 + %s4271_s15]]  }
  0x4b   :  { %93 = vsyncpa [#allocation3], 0 }
  0x4c   :  { %94 = vsyncpa [#allocation6], 0 }
  0x4d   :  { %95 = vsyncpa [#allocation9], 0 }
  0x4e   :  { %96 = vsyncpa [#allocation12], 0 }
  0x4f   :  { %97 = vsyncpa [#allocation15], 0 }
  0x50   :  { %98 = vsyncpa [#allocation18], 0 }
  0x51   :  { %99 = vsyncpa [#allocation21], 0 }
  0x52   :  { %100 = vsyncpa [#allocation24], 0 }
  0x53   :  { %101 = vsyncpa [#allocation27], 0 }
  0x54   :  { %102 = vsyncpa [#allocation30], 0 }
  0x55   :  { %103 = vsyncpa [#allocation33], 0 }
  0x56   :  { %104 = vsyncpa [#allocation36], 0 }
  0x57   :  { %105 = vsyncpa [#allocation39], 0 }
  0x58   :  { %106 = vsyncpa [#allocation42], 0 }
  0x59   :  { %107 = vsyncpa [#allocation45], 0 }
  0x5a   :  { %108 = vsyncpa [#allocation48], 0 }
  0x5b   :  { %109 = vsyncpa [#allocation51], 0 }
  0x5c   :  { %110 = vsyncpa [#allocation4], 0 }
  0x5d   :  { %111 = vsyncpa [#allocation55], 0  ;;  %s4272_s0 = smov [#allocation5]  }
  0x5e   :  { %s129_s22 = sshll.u32 %s4272_s0, 4  ;;  %s130_s22 = int_to_ptr.vmem [resolvable:$true] %s129_s22 }
  0x5f   :  { %s3499_s23 = scalar_lea.vmem %s130_s22, 32  ;;  %p3504_p1 = scmp.lt.s32.totalorder %s130_s22, %s130_s22 }
  0x60   :  { %p3500_p0 = scmp.ne.s32.totalorder %s130_s22, %s3499_s23  ;;  %p3505_p2 = scmp.lt.s32.totalorder %s3499_s23, %s3499_s23 }
  0x62   :  { %p3506_p3 = por %p3505_p2, %p3504_p1 }
  0x64   :  { %p3507_p4 = pnand %p3506_p3, %p3500_p0 }
  0x66   :  { %3510 = shalt.err (!%p3507_p4)
}
  0x67   :  { %s4273_s26 = smov 16   ;;  %s4274_s28 = smov 1  }
  0x68   :  { %135 = dma.hbm_to_vmem [thread:$0]  %s4326_s9, 32, %s130_s22, [#allocation6], %s4273_s26, %s4273_s26, %s4274_s28  }
  0x69   :  { %s4275_s1 = smov [#allocation8]  }
  0x6a   :  { %s154_s2 = sshll.u32 %s4275_s1, 4  ;;  %s155_s2 = int_to_ptr.vmem [resolvable:$true] %s154_s2 }
  0x6b   :  { %s3519_s7 = scalar_lea.vmem %s155_s2, 16  ;;  %s3523_s10 = scalar_lea.vmem %s155_s2, 32 }
  0x6c   :  { %p3520_p5 = scmp.ne.s32.totalorder %s155_s2, %s3519_s7  ;;  %p3524_p6 = scmp.lt.s32.totalorder %s155_s2, %s155_s2 }
  0x6d   :  { %p3525_p7 = scmp.lt.s32.totalorder %s3523_s10, %s3519_s7 }
  0x6f   :  { %p3526_p8 = por %p3525_p7, %p3524_p6 }
  0x71   :  { %p3527_p9 = pnand %p3526_p8, %p3520_p5 }
  0x73   :  { %3530 = shalt.err (!%p3527_p9)
}
  0x74   :  { %157 = dma.hbm_to_vmem [thread:$0]  %s4336_s17, 16, %s155_s2, [#allocation9]  }
  0x75   :  { %s4276_s11 = smov [#allocation11]   ;;  %s4277_s16 = smov [#allocation14]  }
  0x76   :  { %s175_s15 = sshll.u32 %s4276_s11, 4  ;;  %s197_s18 = sshll.u32 %s4277_s16, 4  ;;  %s176_s15 = int_to_ptr.vmem [resolvable:$true] %s175_s15  ;;  %s198_s18 = int_to_ptr.vmem [resolvable:$true] %s197_s18 }
  0x77   :  { %s3539_s9 = scalar_lea.vmem %s176_s15, 512  ;;  %p3544_p11 = scmp.lt.s32.totalorder %s176_s15, %s176_s15 }
  0x78   :  { %p3540_p10 = scmp.ne.s32.totalorder %s176_s15, %s3539_s9  ;;  %p3545_p12 = scmp.lt.s32.totalorder %s3539_s9, %s3539_s9 }
  0x7a   :  { %p3546_p13 = por %p3545_p12, %p3544_p11 }
  0x7c   :  { %p3547_p0 = pnand %p3546_p13, %p3540_p10 }
  0x7e   :  { %3550 = shalt.err (!%p3547_p0)
}
  0x7f   :  { %s4278_s0 = smov 128   ;;  %s4279_s22 = smov 8  }
  0x80   :  { %181 = dma.hbm_to_vmem [thread:$0]  %s4351_s29, 512, %s176_s15, [#allocation12], %s4278_s0, %s4278_s0, %s4279_s22  }
  0x81   :  { %s3559_s17 = scalar_lea.vmem %s198_s18, 512  ;;  %p3564_p2 = scmp.lt.s32.totalorder %s198_s18, %s198_s18 }
  0x82   :  { %p3560_p1 = scmp.ne.s32.totalorder %s198_s18, %s3559_s17  ;;  %p3565_p3 = scmp.lt.s32.totalorder %s3559_s17, %s3559_s17 }
  0x84   :  { %p3566_p4 = por %p3565_p3, %p3564_p2 }
  0x86   :  { %p3567_p5 = pnand %p3566_p4, %p3560_p1 }
  0x88   :  { %3570 = shalt.err (!%p3567_p5)
}
  0x89   :  { %203 = dma.hbm_to_vmem [thread:$0]  %s4361_s8, 512, %s198_s18, [#allocation15], %s4278_s0, %s4278_s0, %s4279_s22  }
  0x8a   :  { %s4280_s23 = smov [#allocation17]   ;;  %s4281_s28 = smov [#allocation20]  }
  0x8b   :  { %s223_s26 = sshll.u32 %s4280_s23, 4  ;;  %s245_s1 = sshll.u32 %s4281_s28, 4  ;;  %s224_s26 = int_to_ptr.vmem [resolvable:$true] %s223_s26  ;;  %s246_s1 = int_to_ptr.vmem [resolvable:$true] %s245_s1 }
  0x8c   :  { %s3579_s2 = scalar_lea.vmem %s224_s26, 512  ;;  %p3584_p7 = scmp.lt.s32.totalorder %s224_s26, %s224_s26 }
  0x8d   :  { %p3580_p6 = scmp.ne.s32.totalorder %s224_s26, %s3579_s2  ;;  %p3585_p8 = scmp.lt.s32.totalorder %s3579_s2, %s3579_s2 }
  0x8f   :  { %p3586_p9 = por %p3585_p8, %p3584_p7 }
  0x91   :  { %p3587_p10 = pnand %p3586_p9, %p3580_p6 }
  0x93   :  { %3590 = shalt.err (!%p3587_p10)
}
  0x94   :  { %229 = dma.hbm_to_vmem [thread:$0]  %s4381_s30, 512, %s224_s26, [#allocation18], %s4278_s0, %s4278_s0, %s4279_s22  }
  0x95   :  { %s3599_s29 = scalar_lea.vmem %s246_s1, 512  ;;  %p3604_p12 = scmp.lt.s32.totalorder %s246_s1, %s246_s1 }
  0x96   :  { %p3600_p11 = scmp.ne.s32.totalorder %s246_s1, %s3599_s29  ;;  %p3605_p13 = scmp.lt.s32.totalorder %s3599_s29, %s3599_s29 }
  0x98   :  { %p3606_p0 = por %p3605_p13, %p3604_p12 }
  0x9a   :  { %p3607_p1 = pnand %p3606_p0, %p3600_p11 }
  0x9c   :  { %3610 = shalt.err (!%p3607_p1)
}
  0x9d   :  { %251 = dma.hbm_to_vmem [thread:$0]  %s4391_s12, 512, %s246_s1, [#allocation21], %s4278_s0, %s4278_s0, %s4279_s22  }
  0x9e   :  { %s4282_s8 = smov [#allocation23]   ;;  %s4283_s10 = smov [#allocation26]  }
  0x9f   :  { %s267_s7 = sshll.u32 %s4282_s8, 4  ;;  %s289_s11 = sshll.u32 %s4283_s10, 4  ;;  %s268_s7 = int_to_ptr.vmem [resolvable:$true] %s267_s7  ;;  %s290_s11 = int_to_ptr.vmem [resolvable:$true] %s289_s11 }
  0xa0   :  { %s3619_s15 = scalar_lea.vmem %s268_s7, 512  ;;  %p3624_p3 = scmp.lt.s32.totalorder %s268_s7, %s268_s7 }
  0xa1   :  { %p3620_p2 = scmp.ne.s32.totalorder %s268_s7, %s3619_s15  ;;  %p3625_p4 = scmp.lt.s32.totalorder %s3619_s15, %s3619_s15 }
  0xa3   :  { %p3626_p5 = por %p3625_p4, %p3624_p3 }
  0xa5   :  { %p3627_p6 = pnand %p3626_p5, %p3620_p2 }
  0xa7   :  { %3630 = shalt.err (!%p3627_p6)
}
  0xa8   :  { %273 = dma.hbm_to_vmem [thread:$0]  %s4401_s27, 512, %s268_s7, [#allocation24], %s4278_s0, %s4278_s0, %s4279_s22  }
  0xa9   :  { %s3639_s30 = scalar_lea.vmem %s290_s11, 512  ;;  %p3644_p8 = scmp.lt.s32.totalorder %s290_s11, %s290_s11 }
  0xaa   :  { %p3640_p7 = scmp.ne.s32.totalorder %s290_s11, %s3639_s30  ;;  %p3645_p9 = scmp.lt.s32.totalorder %s3639_s30, %s3639_s30 }
  0xac   :  { %p3646_p10 = por %p3645_p9, %p3644_p8 }
  0xae   :  { %p3647_p11 = pnand %p3646_p10, %p3640_p7 }
  0xb0   :  { %3650 = shalt.err (!%p3647_p11)
}
  0xb1   :  { %295 = dma.hbm_to_vmem [thread:$0]  %s4411_s24, 512, %s290_s11, [#allocation27], %s4278_s0, %s4278_s0, %s4279_s22  }
  0xb2   :  { %s4284_s12 = smov [#allocation29]   ;;  %s4285_s18 = smov [#allocation32]  }
  0xb3   :  { %s312_s16 = sshll.u32 %s4284_s12, 4  ;;  %s332_s9 = sshll.u32 %s4285_s18, 4  ;;  %s313_s16 = int_to_ptr.vmem [resolvable:$true] %s312_s16  ;;  %s333_s9 = int_to_ptr.vmem [resolvable:$true] %s332_s9 }
  0xb4   :  { %s3659_s17 = scalar_lea.vmem %s313_s16, 16  ;;  %s3663_s27 = scalar_lea.vmem %s313_s16, 32 }
  0xb5   :  { %p3660_p12 = scmp.ne.s32.totalorder %s313_s16, %s3659_s17  ;;  %p3664_p13 = scmp.lt.s32.totalorder %s313_s16, %s313_s16 }
  0xb6   :  { %p3665_p0 = scmp.lt.s32.totalorder %s3663_s27, %s3659_s17 }
  0xb8   :  { %p3666_p1 = por %p3665_p0, %p3664_p13 }
  0xba   :  { %p3667_p2 = pnand %p3666_p1, %p3660_p12 }
  0xbc   :  { %3670 = shalt.err (!%p3667_p2)
}
  0xbd   :  { %315 = dma.hbm_to_vmem [thread:$0]  %s4421_s21, 16, %s313_s16, [#allocation30]  }
  0xbe   :  { %s3679_s23 = scalar_lea.vmem %s333_s9, 16  ;;  %s3683_s26 = scalar_lea.vmem %s333_s9, 32 }
  0xbf   :  { %p3680_p3 = scmp.ne.s32.totalorder %s333_s9, %s3679_s23  ;;  %p3684_p4 = scmp.lt.s32.totalorder %s333_s9, %s333_s9 }
  0xc0   :  { %p3685_p5 = scmp.lt.s32.totalorder %s3683_s26, %s3679_s23 }
  0xc2   :  { %p3686_p6 = por %p3685_p5, %p3684_p4 }
  0xc4   :  { %p3687_p7 = pnand %p3686_p6, %p3680_p3 }
  0xc6   :  { %3690 = shalt.err (!%p3687_p7)
}
  0xc7   :  { %335 = dma.hbm_to_vmem [thread:$0]  %s4431_s20, 16, %s333_s9, [#allocation33]  }
  0xc8   :  { %s4286_s24 = smov [#allocation35]   ;;  %s4287_s1 = smov [#allocation38]  }
  0xc9   :  { %s351_s28 = sshll.u32 %s4286_s24, 4  ;;  %s373_s2 = sshll.u32 %s4287_s1, 4  ;;  %s352_s28 = int_to_ptr.vmem [resolvable:$true] %s351_s28  ;;  %s374_s2 = int_to_ptr.vmem [resolvable:$true] %s373_s2 }
  0xca   :  { %s3699_s29 = scalar_lea.vmem %s352_s28, 512  ;;  %p3704_p9 = scmp.lt.s32.totalorder %s352_s28, %s352_s28 }
  0xcb   :  { %p3700_p8 = scmp.ne.s32.totalorder %s352_s28, %s3699_s29  ;;  %p3705_p10 = scmp.lt.s32.totalorder %s3699_s29, %s3699_s29 }
  0xcd   :  { %p3706_p11 = por %p3705_p10, %p3704_p9 }
  0xcf   :  { %p3707_p12 = pnand %p3706_p11, %p3700_p8 }
  0xd1   :  { %3710 = shalt.err (!%p3707_p12)
}
  0xd2   :  { %357 = dma.hbm_to_vmem [thread:$0]  %s4441_s6, 512, %s352_s28, [#allocation36], %s4278_s0, %s4278_s0, %s4279_s22  }
  0xd3   :  { %s3719_s21 = scalar_lea.vmem %s374_s2, 512  ;;  %p3724_p0 = scmp.lt.s32.totalorder %s374_s2, %s374_s2 }
  0xd4   :  { %p3720_p13 = scmp.ne.s32.totalorder %s374_s2, %s3719_s21  ;;  %p3725_p1 = scmp.lt.s32.totalorder %s3719_s21, %s3719_s21 }
  0xd6   :  { %p3726_p2 = por %p3725_p1, %p3724_p0 }
  0xd8   :  { %p3727_p3 = pnand %p3726_p2, %p3720_p13 }
  0xda   :  { %3730 = shalt.err (!%p3727_p3)
}
  0xdb   :  { %379 = dma.hbm_to_vmem [thread:$0]  %s4451_s14, 512, %s374_s2, [#allocation39], %s4278_s0, %s4278_s0, %s4279_s22  }
  0xdc   :  { %s4288_s20 = smov [#allocation41]   ;;  %s4289_s7 = smov [#allocation44]  }
  0xdd   :  { %s398_s8 = sshll.u32 %s4288_s20, 4  ;;  %s420_s10 = sshll.u32 %s4289_s7, 4  ;;  %s399_s8 = int_to_ptr.vmem [resolvable:$true] %s398_s8  ;;  %s421_s10 = int_to_ptr.vmem [resolvable:$true] %s420_s10 }
  0xde   :  { %s3739_s11 = scalar_lea.vmem %s399_s8, 16  ;;  %s3743_s6 = scalar_lea.vmem %s399_s8, 32 }
  0xdf   :  { %p3740_p4 = scmp.ne.s32.totalorder %s399_s8, %s3739_s11  ;;  %p3744_p5 = scmp.lt.s32.totalorder %s399_s8, %s399_s8 }
  0xe0   :  { %p3745_p6 = scmp.lt.s32.totalorder %s3743_s6, %s3739_s11 }
  0xe2   :  { %p3746_p7 = por %p3745_p6, %p3744_p5 }
  0xe4   :  { %p3747_p8 = pnand %p3746_p7, %p3740_p4 }
  0xe6   :  { %3750 = shalt.err (!%p3747_p8)
}
  0xe7   :  { %401 = dma.hbm_to_vmem [thread:$0]  %s4466_s4, 16, %s399_s8, [#allocation42]  }
  0xe8   :  { %s3759_s15 = scalar_lea.vmem %s421_s10, 16  ;;  %s3763_s30 = scalar_lea.vmem %s421_s10, 32 }
  0xe9   :  { %p3760_p9 = scmp.ne.s32.totalorder %s421_s10, %s3759_s15  ;;  %p3764_p10 = scmp.lt.s32.totalorder %s421_s10, %s421_s10 }
  0xea   :  { %p3765_p11 = scmp.lt.s32.totalorder %s3763_s30, %s3759_s15 }
  0xec   :  { %p3766_p12 = por %p3765_p11, %p3764_p10 }
  0xee   :  { %p3767_p13 = pnand %p3766_p12, %p3760_p9 }
  0xf0   :  { %3770 = shalt.err (!%p3767_p13)
}
  0xf1   :  { %423 = dma.hbm_to_vmem [thread:$0]  %s4476_s19, 16, %s421_s10, [#allocation45]  }
  0xf2   :  { %s4290_s14 = smov [#allocation47]   ;;  %s4291_s16 = smov [#allocation50]  }
  0xf3   :  { %s442_s12 = sshll.u32 %s4290_s14, 4  ;;  %s464_s18 = sshll.u32 %s4291_s16, 4  ;;  %s443_s12 = int_to_ptr.vmem [resolvable:$true] %s442_s12  ;;  %s465_s18 = int_to_ptr.vmem [resolvable:$true] %s464_s18 }
  0xf4   :  { %s3779_s9 = scalar_lea.vmem %s443_s12, 16  ;;  %s3783_s17 = scalar_lea.vmem %s443_s12, 32 }
  0xf5   :  { %p3780_p0 = scmp.ne.s32.totalorder %s443_s12, %s3779_s9  ;;  %p3784_p1 = scmp.lt.s32.totalorder %s443_s12, %s443_s12 }
  0xf6   :  { %p3785_p2 = scmp.lt.s32.totalorder %s3783_s17, %s3779_s9 }
  0xf8   :  { %p3786_p3 = por %p3785_p2, %p3784_p1 }
  0xfa   :  { %p3787_p4 = pnand %p3786_p3, %p3780_p0 }
  0xfc   :  { %3790 = shalt.err (!%p3787_p4)
}
  0xfd   :  { %s4797_s4 = sld [smem:[#allocation94_spill]]  ;;  %s3799_s27 = scalar_lea.vmem %s465_s18, 16 }
  0xfe   :  { %p3800_p5 = scmp.ne.s32.totalorder %s465_s18, %s3799_s27  ;;  %s3803_s23 = scalar_lea.vmem %s465_s18, 32 }
  0xff   :  { %p3804_p6 = scmp.lt.s32.totalorder %s465_s18, %s465_s18  ;;  %p3805_p7 = scmp.lt.s32.totalorder %s3803_s23, %s3799_s27 }
 0x101   :  { %p3806_p8 = por %p3805_p7, %p3804_p6 }
 0x103   :  { %445 = dma.hbm_to_vmem [thread:$0]  %s4797_s4, 16, %s443_s12, [#allocation48]  }
 0x104   :  { %p3807_p9 = pnand %p3806_p8, %p3800_p5 }
 0x106   :  { %3810 = shalt.err (!%p3807_p9)
}
 0x107   :  { %s4798_s19 = sld [smem:[#allocation96_spill]]  ;;  %s4292_s26 = smov [#allocation2]  }
 0x108   :  { %s117_s24 = sshll.u32 %s4292_s26, 4  ;;  %s4293_s28 = smov [#allocation7]   ;;  %s118_s24 = int_to_ptr.vmem [resolvable:$true] %s117_s24 }
 0x109   :  { %s141_s1 = sshll.u32 %s4293_s28, 4  ;;  %s3819_s2 = scalar_lea.vmem %s118_s24, 256  ;;  %s142_s1 = int_to_ptr.vmem [resolvable:$true] %s141_s1 }
 0x10a   :  { %p3820_p10 = scmp.ne.s32.totalorder %s118_s24, %s3819_s2  ;;  %p3824_p11 = scmp.lt.s32.totalorder %s118_s24, %s118_s24 }
 0x10b   :  { %p3825_p12 = scmp.lt.s32.totalorder %s3819_s2, %s3819_s2 }
 0x10d   :  { %467 = dma.hbm_to_vmem [thread:$0]  %s4798_s19, 16, %s465_s18, [#allocation51]  }
 0x10e   :  { %p3826_p13 = por %p3825_p12, %p3824_p11 }
 0x110   :  { %p3827_p0 = pnand %p3826_p13, %p3820_p10 }
 0x112   :  { %3830 = shalt.err (!%p3827_p0)
}
 0x113   :  { %s4799_s29 = sld [smem:[#allocation75_spill]]  ;;  %s3839_s21 = scalar_lea.vmem %s142_s1, 256 }
 0x114   :  { %p3840_p1 = scmp.ne.s32.totalorder %s142_s1, %s3839_s21  ;;  %p3844_p2 = scmp.lt.s32.totalorder %s142_s1, %s142_s1 }
 0x115   :  { %p3845_p3 = scmp.lt.s32.totalorder %s3839_s21, %s3839_s21 }
 0x117   :  { %p3846_p4 = por %p3845_p3, %p3844_p2 }
 0x119   :  { %123 = dma.hbm_to_vmem [thread:$0]  %s4799_s29, 256, %s118_s24, [#allocation3], %s4278_s0, %s4278_s0, %s4279_s22  }
 0x11a   :  { %p3847_p5 = pnand %p3846_p4, %p3840_p1 }
 0x11c   :  { %3850 = shalt.err (!%p3847_p5)
}
 0x11d   :  { %s4800_s20 = sld [smem:[#allocation76_spill]]  ;;  %s4294_s8 = smov [#allocation10]  }
 0x11e   :  { %s166_s7 = sshll.u32 %s4294_s8, 4  ;;  %s4295_s10 = smov [#allocation13]   ;;  %s167_s7 = int_to_ptr.vmem [resolvable:$true] %s166_s7 }
 0x11f   :  { %s188_s11 = sshll.u32 %s4295_s10, 4  ;;  %s3859_s6 = scalar_lea.vmem %s167_s7, 16  ;;  %s189_s11 = int_to_ptr.vmem [resolvable:$true] %s188_s11 }
 0x120   :  { %p3860_p6 = scmp.ne.s32.totalorder %s167_s7, %s3859_s6  ;;  %s3863_s15 = scalar_lea.vmem %s167_s7, 32 }
 0x121   :  { %p3864_p7 = scmp.lt.s32.totalorder %s167_s7, %s167_s7  ;;  %p3865_p8 = scmp.lt.s32.totalorder %s3863_s15, %s3859_s6 }
 0x123   :  { %147 = dma.hbm_to_vmem [thread:$0]  %s4800_s20, 256, %s142_s1, [#allocation6], %s4278_s0, %s4278_s0, %s4279_s22  }
 0x124   :  { %p3866_p9 = por %p3865_p8, %p3864_p7 }
 0x126   :  { %p3867_p10 = pnand %p3866_p9, %p3860_p6 }
 0x128   :  { %3870 = shalt.err (!%p3867_p10)
}
 0x129   :  { %s4801_s30 = sld [smem:[#allocation78_spill]]  ;;  %s3879_s14 = scalar_lea.vmem %s189_s11, 16 }
 0x12a   :  { %p3880_p11 = scmp.ne.s32.totalorder %s189_s11, %s3879_s14  ;;  %s3883_s12 = scalar_lea.vmem %s189_s11, 32 }
 0x12b   :  { %p3884_p12 = scmp.lt.s32.totalorder %s189_s11, %s189_s11  ;;  %p3885_p13 = scmp.lt.s32.totalorder %s3883_s12, %s3879_s14 }
 0x12d   :  { %p3886_p0 = por %p3885_p13, %p3884_p12 }
 0x12f   :  { %169 = dma.hbm_to_vmem [thread:$0]  %s4801_s30, 16, %s167_s7, [#allocation9]  }
 0x130   :  { %p3887_p1 = pnand %p3886_p0, %p3880_p11 }
 0x132   :  { %3890 = shalt.err (!%p3887_p1)
}
 0x133   :  { %s4802_s16 = sld [smem:[#allocation79_spill]]  ;;  %s4296_s18 = smov [#allocation16]  }
 0x134   :  { %s210_s9 = sshll.u32 %s4296_s18, 4  ;;  %s4297_s17 = smov [#allocation19]   ;;  %s211_s9 = int_to_ptr.vmem [resolvable:$true] %s210_s9 }
 0x135   :  { %s236_s4 = sshll.u32 %s4297_s17, 4  ;;  %s3899_s27 = scalar_lea.vmem %s211_s9, 16  ;;  %s237_s4 = int_to_ptr.vmem [resolvable:$true] %s236_s4 }
 0x136   :  { %p3900_p2 = scmp.ne.s32.totalorder %s211_s9, %s3899_s27  ;;  %s3903_s23 = scalar_lea.vmem %s211_s9, 32 }
 0x137   :  { %p3904_p3 = scmp.lt.s32.totalorder %s211_s9, %s211_s9  ;;  %p3905_p4 = scmp.lt.s32.totalorder %s3903_s23, %s3899_s27 }
 0x139   :  { %191 = dma.hbm_to_vmem [thread:$0]  %s4802_s16, 16, %s189_s11, [#allocation12]  }
 0x13a   :  { %p3906_p5 = por %p3905_p4, %p3904_p3 }
 0x13c   :  { %p3907_p6 = pnand %p3906_p5, %p3900_p2 }
 0x13e   :  { %3910 = shalt.err (!%p3907_p6)
}
 0x13f   :  { %s4803_s19 = sld [smem:[#allocation80_spill]]  ;;  %s3919_s26 = scalar_lea.vmem %s237_s4, 16 }
 0x140   :  { %p3920_p7 = scmp.ne.s32.totalorder %s237_s4, %s3919_s26  ;;  %s3923_s24 = scalar_lea.vmem %s237_s4, 32 }
 0x141   :  { %p3924_p8 = scmp.lt.s32.totalorder %s237_s4, %s237_s4  ;;  %p3925_p9 = scmp.lt.s32.totalorder %s3923_s24, %s3919_s26 }
 0x143   :  { %p3926_p10 = por %p3925_p9, %p3924_p8 }
 0x145   :  { %213 = dma.hbm_to_vmem [thread:$0]  %s4803_s19, 16, %s211_s9, [#allocation15]  }
 0x146   :  { %p3927_p11 = pnand %p3926_p10, %p3920_p7 }
 0x148   :  { %3930 = shalt.err (!%p3927_p11)
}
 0x149   :  { %s4804_s28 = sld [smem:[#allocation83_spill]]  ;;  %s4298_s1 = smov [#allocation22]  }
 0x14a   :  { %s258_s2 = sshll.u32 %s4298_s1, 4  ;;  %s4299_s29 = smov [#allocation25]   ;;  %s259_s2 = int_to_ptr.vmem [resolvable:$true] %s258_s2 }
 0x14b   :  { %s280_s21 = sshll.u32 %s4299_s29, 4  ;;  %s3939_s20 = scalar_lea.vmem %s259_s2, 16  ;;  %s281_s21 = int_to_ptr.vmem [resolvable:$true] %s280_s21 }
 0x14c   :  { %p3940_p12 = scmp.ne.s32.totalorder %s259_s2, %s3939_s20  ;;  %s3943_s8 = scalar_lea.vmem %s259_s2, 32 }
 0x14d   :  { %p3944_p13 = scmp.lt.s32.totalorder %s259_s2, %s259_s2  ;;  %p3945_p0 = scmp.lt.s32.totalorder %s3943_s8, %s3939_s20 }
 0x14f   :  { %239 = dma.hbm_to_vmem [thread:$0]  %s4804_s28, 16, %s237_s4, [#allocation18]  }
 0x150   :  { %p3946_p1 = por %p3945_p0, %p3944_p13 }
 0x152   :  { %p3947_p2 = pnand %p3946_p1, %p3940_p12 }
 0x154   :  { %3950 = shalt.err (!%p3947_p2)
}
 0x155   :  { %s4805_s7 = sld [smem:[#allocation84_spill]]  ;;  %s3959_s10 = scalar_lea.vmem %s281_s21, 16 }
 0x156   :  { %p3960_p3 = scmp.ne.s32.totalorder %s281_s21, %s3959_s10  ;;  %s3963_s11 = scalar_lea.vmem %s281_s21, 32 }
 0x157   :  { %p3964_p4 = scmp.lt.s32.totalorder %s281_s21, %s281_s21  ;;  %p3965_p5 = scmp.lt.s32.totalorder %s3963_s11, %s3959_s10 }
 0x159   :  { %p3966_p6 = por %p3965_p5, %p3964_p4 }
 0x15b   :  { %261 = dma.hbm_to_vmem [thread:$0]  %s4805_s7, 16, %s259_s2, [#allocation21]  }
 0x15c   :  { %p3967_p7 = pnand %p3966_p6, %p3960_p3 }
 0x15e   :  { %3970 = shalt.err (!%p3967_p7)
}
 0x15f   :  { %s4806_s6 = sld [smem:[#allocation85_spill]]  ;;  %s4300_s15 = smov [#allocation28]  }
 0x160   :  { %s302_s30 = sshll.u32 %s4300_s15, 4  ;;  %s4301_s14 = smov [#allocation31]   ;;  %s303_s30 = int_to_ptr.vmem [resolvable:$true] %s302_s30 }
 0x161   :  { %s322_s12 = sshll.u32 %s4301_s14, 4  ;;  %s3979_s16 = scalar_lea.vmem %s303_s30, 16  ;;  %s323_s12 = int_to_ptr.vmem [resolvable:$true] %s322_s12 }
 0x162   :  { %p3980_p8 = scmp.ne.s32.totalorder %s303_s30, %s3979_s16  ;;  %s3983_s18 = scalar_lea.vmem %s303_s30, 32 }
 0x163   :  { %p3984_p9 = scmp.lt.s32.totalorder %s303_s30, %s303_s30  ;;  %p3985_p10 = scmp.lt.s32.totalorder %s3983_s18, %s3979_s16 }
 0x165   :  { %283 = dma.hbm_to_vmem [thread:$0]  %s4806_s6, 16, %s281_s21, [#allocation24]  }
 0x166   :  { %p3986_p11 = por %p3985_p10, %p3984_p9 }
 0x168   :  { %p3987_p12 = pnand %p3986_p11, %p3980_p8 }
 0x16a   :  { %3990 = shalt.err (!%p3987_p12)
}
 0x16b   :  { %s4807_s9 = sld [smem:[#allocation86_spill]]  ;;  %s3999_s17 = scalar_lea.vmem %s323_s12, 16 }
 0x16c   :  { %p4000_p13 = scmp.ne.s32.totalorder %s323_s12, %s3999_s17  ;;  %s4003_s4 = scalar_lea.vmem %s323_s12, 32 }
 0x16d   :  { %p4004_p0 = scmp.lt.s32.totalorder %s323_s12, %s323_s12  ;;  %p4005_p1 = scmp.lt.s32.totalorder %s4003_s4, %s3999_s17 }
 0x16f   :  { %p4006_p2 = por %p4005_p1, %p4004_p0 }
 0x171   :  { %305 = dma.hbm_to_vmem [thread:$0]  %s4807_s9, 16, %s303_s30, [#allocation27]  }
 0x172   :  { %p4007_p3 = pnand %p4006_p2, %p4000_p13 }
 0x174   :  { %4010 = shalt.err (!%p4007_p3)
}
 0x175   :  { %s4808_s27 = sld [smem:[#allocation87_spill]]  ;;  %s4302_s23 = smov [#allocation34]  }
 0x176   :  { %s342_s19 = sshll.u32 %s4302_s23, 4  ;;  %s4303_s26 = smov [#allocation37]   ;;  %s343_s19 = int_to_ptr.vmem [resolvable:$true] %s342_s19 }
 0x177   :  { %s364_s24 = sshll.u32 %s4303_s26, 4  ;;  %s4019_s28 = scalar_lea.vmem %s343_s19, 16  ;;  %s365_s24 = int_to_ptr.vmem [resolvable:$true] %s364_s24 }
 0x178   :  { %p4020_p4 = scmp.ne.s32.totalorder %s343_s19, %s4019_s28  ;;  %s4023_s1 = scalar_lea.vmem %s343_s19, 32 }
 0x179   :  { %p4024_p5 = scmp.lt.s32.totalorder %s343_s19, %s343_s19  ;;  %p4025_p6 = scmp.lt.s32.totalorder %s4023_s1, %s4019_s28 }
 0x17b   :  { %325 = dma.hbm_to_vmem [thread:$0]  %s4808_s27, 16, %s323_s12, [#allocation30]  }
 0x17c   :  { %p4026_p7 = por %p4025_p6, %p4024_p5 }
 0x17e   :  { %p4027_p8 = pnand %p4026_p7, %p4020_p4 }
 0x180   :  { %4030 = shalt.err (!%p4027_p8)
}
 0x181   :  { %s4809_s2 = sld [smem:[#allocation88_spill]]  ;;  %s4039_s29 = scalar_lea.vmem %s365_s24, 16 }
 0x182   :  { %p4040_p9 = scmp.ne.s32.totalorder %s365_s24, %s4039_s29  ;;  %s4043_s21 = scalar_lea.vmem %s365_s24, 32 }
 0x183   :  { %p4044_p10 = scmp.lt.s32.totalorder %s365_s24, %s365_s24  ;;  %p4045_p11 = scmp.lt.s32.totalorder %s4043_s21, %s4039_s29 }
 0x185   :  { %p4046_p12 = por %p4045_p11, %p4044_p10 }
 0x187   :  { %345 = dma.hbm_to_vmem [thread:$0]  %s4809_s2, 16, %s343_s19, [#allocation33]  }
 0x188   :  { %p4047_p13 = pnand %p4046_p12, %p4040_p9 }
 0x18a   :  { %4050 = shalt.err (!%p4047_p13)
}
 0x18b   :  { %s4810_s20 = sld [smem:[#allocation89_spill]]  ;;  %s4304_s8 = smov [#allocation40]  }
 0x18c   :  { %s386_s7 = sshll.u32 %s4304_s8, 4  ;;  %s4305_s10 = smov [#allocation43]   ;;  %s387_s7 = int_to_ptr.vmem [resolvable:$true] %s386_s7 }
 0x18d   :  { %s407_s11 = sshll.u32 %s4305_s10, 4  ;;  %s4059_s6 = scalar_lea.vmem %s387_s7, 16  ;;  %s408_s11 = int_to_ptr.vmem [resolvable:$true] %s407_s11 }
 0x18e   :  { %p4060_p0 = scmp.ne.s32.totalorder %s387_s7, %s4059_s6  ;;  %s4063_s15 = scalar_lea.vmem %s387_s7, 32 }
 0x18f   :  { %p4064_p1 = scmp.lt.s32.totalorder %s387_s7, %s387_s7  ;;  %p4065_p2 = scmp.lt.s32.totalorder %s4063_s15, %s4059_s6 }
 0x191   :  { %367 = dma.hbm_to_vmem [thread:$0]  %s4810_s20, 16, %s365_s24, [#allocation36]  }
 0x192   :  { %p4066_p3 = por %p4065_p2, %p4064_p1 }
 0x194   :  { %p4067_p4 = pnand %p4066_p3, %p4060_p0 }
 0x196   :  { %4070 = shalt.err (!%p4067_p4)
}
 0x197   :  { %s4811_s30 = sld [smem:[#allocation90_spill]]  ;;  %s4079_s14 = scalar_lea.vmem %s408_s11, 512 }
 0x198   :  { %p4080_p5 = scmp.ne.s32.totalorder %s408_s11, %s4079_s14  ;;  %p4084_p6 = scmp.lt.s32.totalorder %s408_s11, %s408_s11 }
 0x199   :  { %p4085_p7 = scmp.lt.s32.totalorder %s4079_s14, %s4079_s14 }
 0x19b   :  { %p4086_p8 = por %p4085_p7, %p4084_p6 }
 0x19d   :  { %389 = dma.hbm_to_vmem [thread:$0]  %s4811_s30, 16, %s387_s7, [#allocation39]  }
 0x19e   :  { %p4087_p9 = pnand %p4086_p8, %p4080_p5 }
 0x1a0   :  { %4090 = shalt.err (!%p4087_p9)
}
 0x1a1   :  { %s4812_s12 = sld [smem:[#allocation92_spill]]  ;;  %s4306_s16 = smov [#allocation46]  }
 0x1a2   :  { %s429_s18 = sshll.u32 %s4306_s16, 4  ;;  %s4307_s9 = smov [#allocation49]   ;;  %s430_s18 = int_to_ptr.vmem [resolvable:$true] %s429_s18 }
 0x1a3   :  { %s451_s17 = sshll.u32 %s4307_s9, 4  ;;  %s4099_s4 = scalar_lea.vmem %s430_s18, 512  ;;  %s452_s17 = int_to_ptr.vmem [resolvable:$true] %s451_s17 }
 0x1a4   :  { %p4100_p10 = scmp.ne.s32.totalorder %s430_s18, %s4099_s4  ;;  %p4104_p11 = scmp.lt.s32.totalorder %s430_s18, %s430_s18 }
 0x1a5   :  { %p4105_p12 = scmp.lt.s32.totalorder %s4099_s4, %s4099_s4 }
 0x1a7   :  { %413 = dma.hbm_to_vmem [thread:$0]  %s4812_s12, 512, %s408_s11, [#allocation42], %s4278_s0, %s4278_s0, %s4279_s22  }
 0x1a8   :  { %p4106_p13 = por %p4105_p12, %p4104_p11 }
 0x1aa   :  { %p4107_p0 = pnand %p4106_p13, %p4100_p10 }
 0x1ac   :  { %4110 = shalt.err (!%p4107_p0)
}
 0x1ad   :  { %s4813_s27 = sld [smem:[#allocation93_spill]]  ;;  %s4119_s23 = scalar_lea.vmem %s452_s17, 512 }
 0x1ae   :  { %p4120_p1 = scmp.ne.s32.totalorder %s452_s17, %s4119_s23  ;;  %p4124_p2 = scmp.lt.s32.totalorder %s452_s17, %s452_s17 }
 0x1af   :  { %p4125_p3 = scmp.lt.s32.totalorder %s4119_s23, %s4119_s23 }
 0x1b1   :  { %p4126_p4 = por %p4125_p3, %p4124_p2 }
 0x1b3   :  { %435 = dma.hbm_to_vmem [thread:$0]  %s4813_s27, 512, %s430_s18, [#allocation45], %s4278_s0, %s4278_s0, %s4279_s22  }
 0x1b4   :  { %p4127_p5 = pnand %p4126_p4, %p4120_p1 }
 0x1b6   :  { %4130 = shalt.err (!%p4127_p5)
}
 0x1b7   :  { %s4814_s19 = sld [smem:[#allocation95_spill]]  ;;  %s4308_s26 = smov [#allocation52]  }
 0x1b8   :  { %s474_s24 = sshll.u32 %s4308_s26, 4  ;;  %s475_s24 = int_to_ptr.vmem [resolvable:$true] %s474_s24 }
 0x1b9   :  { %s4139_s28 = scalar_lea.vmem %s475_s24, 16  ;;  %s4143_s1 = scalar_lea.vmem %s475_s24, 32 }
 0x1ba   :  { %p4140_p6 = scmp.ne.s32.totalorder %s475_s24, %s4139_s28  ;;  %p4144_p7 = scmp.lt.s32.totalorder %s475_s24, %s475_s24 }
 0x1bb   :  { %p4145_p8 = scmp.lt.s32.totalorder %s4143_s1, %s4139_s28 }
 0x1bd   :  { %457 = dma.hbm_to_vmem [thread:$0]  %s4814_s19, 512, %s452_s17, [#allocation48], %s4278_s0, %s4278_s0, %s4279_s22  }
 0x1be   :  { %p4146_p9 = por %p4145_p8, %p4144_p7 }
 0x1c0   :  { %p4147_p10 = pnand %p4146_p9, %p4140_p6 }
 0x1c2   :  { %4150 = shalt.err (!%p4147_p10)
}
 0x1c3   :  { %s4815_s2 = sld [smem:[#allocation97_spill]] }
 0x1c9   :  { %477 = dma.hbm_to_vmem [thread:$0]  %s4815_s2, 16, %s475_s24, [#allocation51]  }
 0x1ca   :  { %4191 = dma.done.wait [#allocation3], 256  }
 0x1cb   :  { %4192 = vsyncadd [#allocation3], 4294967040 }
 0x1cc   :  { %4193 = dma.done.wait [#allocation6], 288  }
 0x1cd   :  { %4194 = vsyncadd [#allocation6], 4294967008 }
 0x1ce   :  { %4195 = dma.done.wait [#allocation9], 32  }
 0x1cf   :  { %4196 = vsyncadd [#allocation9], 4294967264 }
 0x1d0   :  { %4197 = dma.done.wait [#allocation12], 528  }
 0x1d1   :  { %4198 = vsyncadd [#allocation12], 4294966768 }
 0x1d2   :  { %4199 = dma.done.wait [#allocation15], 528  }
 0x1d3   :  { %4200 = vsyncadd [#allocation15], 4294966768 }
 0x1d4   :  { %4201 = dma.done.wait [#allocation18], 528  }
 0x1d5   :  { %4202 = vsyncadd [#allocation18], 4294966768 }
 0x1d6   :  { %4203 = dma.done.wait [#allocation21], 528  }
 0x1d7   :  { %4204 = vsyncadd [#allocation21], 4294966768 }
 0x1d8   :  { %4205 = dma.done.wait [#allocation24], 528  }
 0x1d9   :  { %4206 = vsyncadd [#allocation24], 4294966768 }
 0x1da   :  { %4207 = dma.done.wait [#allocation27], 528  }
 0x1db   :  { %4208 = vsyncadd [#allocation27], 4294966768 }
 0x1dc   :  { %4209 = dma.done.wait [#allocation30], 32  }
 0x1dd   :  { %4210 = vsyncadd [#allocation30], 4294967264 }
 0x1de   :  { %4211 = dma.done.wait [#allocation33], 32  }
 0x1df   :  { %4212 = vsyncadd [#allocation33], 4294967264 }
 0x1e0   :  { %4213 = dma.done.wait [#allocation36], 528  }
 0x1e1   :  { %4214 = vsyncadd [#allocation36], 4294966768 }
 0x1e2   :  { %4215 = dma.done.wait [#allocation39], 528  }
 0x1e3   :  { %4216 = vsyncadd [#allocation39], 4294966768 }
 0x1e4   :  { %4217 = dma.done.wait [#allocation42], 528  }
 0x1e5   :  { %4218 = vsyncadd [#allocation42], 4294966768 }
 0x1e6   :  { %4219 = dma.done.wait [#allocation45], 528  }
 0x1e7   :  { %4220 = vsyncadd [#allocation45], 4294966768 }
 0x1e8   :  { %4221 = dma.done.wait [#allocation48], 528  }
 0x1e9   :  { %4222 = vsyncadd [#allocation48], 4294966768 }
 0x1ea   :  { %4223 = dma.done.wait [#allocation51], 32  }
 0x1eb   :  { %4224 = vsyncadd [#allocation51], 4294967264  ;;  %s4816_s29 = sld [smem:[#allocation77_spill]]  ;;  %vm610_vm0 = vcmask 130048   ;;  %v592_v0 = vld [vmem:[#allocation7 + $0x8] sm:$0xff]  ;;  %v591_v1 = vld [vmem:[#allocation7] sm:$0xff] }
 0x1ec   :  { %v587_v2 = vld [vmem:[#allocation2] sm:$0xff]  ;;  %3163 = vmatprep.subr.mxu0 %v592_v0  ;;  %v588_v4 = vld [vmem:[#allocation2 + $0x8] sm:$0xff]  ;;  %vm698_vm1 = vcmask 261120   ;;  %s4817_s21 = sld [smem:[#allocation81_spill]]  ;;  %v601_v14 = vld [vmem:[#allocation11 + $0x10] sm:$0xff]  ;;  %v4309_v41 = vmov 0.0  }
 0x1ed   :  { %3167 = vmatprep.mubr.msk.f32.mxu0 %vm610_vm0, %v587_v2  ;;  %3164 = vmatpush3.msra.mxu0 %v592_v0  ;;  %v2983_v9 = vld [vmem:[#allocation8] ss:$0 sm:$0xff]  ;;  %v600_v15 = vld [vmem:[#allocation11 + $0x8] sm:$0xff]  ;;  %v599_v16 = vld [vmem:[#allocation11] sm:$0xff]  ;;  %s4818_s20 = sld [smem:[#allocation82_spill]]  ;;  %vm4310_vm2 = vmmov 0  }
 0x1ee   :  { %3165 = vmatprep.subr.mxu0 %v591_v1  ;;  %v602_v13 = vld [vmem:[#allocation11 + $0x18] sm:$0xff]  ;;  %v870_v28 = vld [vmem:[#allocation14 + $0x8] sm:$0xff]  ;;  %v869_v30 = vld [vmem:[#allocation14] sm:$0xff]  ;;  %vm1318_vm3 = vcmask 64512   ;;  %s4819_s8 = sld [smem:[#allocation91_spill]] }
 0x1ef   :  { %3166 = vmatpush3.msra.mxu0 %v591_v1  ;;  %v872_v17 = vld [vmem:[#allocation14 + $0x18] sm:$0xff]  ;;  %v871_v19 = vld [vmem:[#allocation14 + $0x10] sm:$0xff]  ;;  %v879_v40 = vld [vmem:[#allocation17] sm:$0xff]  ;;  %s4820_s7 = sld [smem:[#allocation98_spill]] }
 0x1f0   :  { %3168 = vmatmul.mubr.msk.f32.vlgmr.msra.gmra.mxu0 %vm610_vm0, %v588_v4  ;;  %3181 = vmatprep.subr.mxu0 %v602_v13  ;;  %v2986_v20 = vld [vmem:[#allocation10] ss:$0 sm:$0xff]  ;;  %v2989_v34 = vld [vmem:[#allocation13] ss:$0 sm:$0xff]  ;;  %v881_v38 = vld [vmem:[#allocation17 + $0x10] sm:$0xff]  ;;  %s4821_s10 = sld [smem:[#allocation99_spill]] }
 0x1f1   :  { %v597_v3 = vld [vmem:[%s4816_s29 + $0x18] sm:$0xff]  ;;  %v596_v5 = vld [vmem:[%s4816_s29 + $0x10] sm:$0xff]  ;;  %v595_v6 = vld [vmem:[%s4816_s29 + $0x8] sm:$0xff]  ;;  %3182 = vmatpush3.msra.mxu0 %v602_v13  ;;  %s4822_s11 = sld [smem:[#allocation100_spill]] }
 0x1f2   :  { %3170 = vmatprep.subr.mxu1 %v597_v3  ;;  %v594_v7 = vld [vmem:[%s4816_s29] sm:$0xff]  ;;  %3183 = vmatprep.subr.mxu0 %v601_v14  ;;  %v877_v18 = vld [vmem:[%s4817_s21 + $0x18] sm:$0xff]  ;;  %v876_v27 = vld [vmem:[%s4817_s21 + $0x10] sm:$0xff] }
 0x1f3   :  { %3171 = vmatpush3.msra.mxu1 %v597_v3  ;;  %3184 = vmatpush3.msra.mxu0 %v601_v14  ;;  %v875_v29 = vld [vmem:[%s4817_s21 + $0x8] sm:$0xff]  ;;  %v874_v31 = vld [vmem:[%s4817_s21] sm:$0xff]  ;;  %v880_v39 = vld [vmem:[#allocation17 + $0x8] sm:$0xff] }
 0x1f4   :  { %3172 = vmatprep.subr.mxu1 %v596_v5  ;;  %3185 = vmatprep.subr.mxu0 %v600_v15  ;;  %v882_v32 = vld [vmem:[#allocation17 + $0x18] sm:$0xff]  ;;  %v2995_v45 = vld [vmem:[%s4818_s20] ss:$0 sm:$0xff]  ;;  %v2998_v54 = vld [vmem:[#allocation19] ss:$0 sm:$0xff] }
 0x1f5   :  { %3173 = vmatpush3.msra.mxu1 %v596_v5  ;;  %3186 = vmatpush3.msra.mxu0 %v600_v15  ;;  %v2992_v44 = vld [vmem:[#allocation16] ss:$0 sm:$0xff]  ;;  %v4657_v59 = vld [vmem:[#allocation5] ss:$0 sm:$0xff]  ;;  %v4660_v63 = vld [vmem:[#allocation5 + $0x1] ss:$0 sm:$0xff] }
 0x1f6   :  { %3174 = vmatprep.subr.mxu1 %v595_v6  ;;  %3187 = vmatprep.subr.mxu0 %v599_v16  ;;  %v887_v15 = vld [vmem:[#allocation20 + $0x18] sm:$0xff] }
 0x1f7   :  { %3175 = vmatpush3.msra.mxu1 %v595_v6  ;;  %3188 = vmatpush3.msra.mxu0 %v599_v16 }
 0x1f8   :  { %3176 = vmatprep.subr.mxu1 %v594_v7  ;;  %3203 = vmatprep.subr.mxu0 %v877_v18 }
 0x1f9   :  { %3177 = vmatpush3.msra.mxu1 %v594_v7 }
 0x1fa   :  { %3192 = vmatprep.subr.mxu1 %v872_v17 }
 0x2b0   :  { %v3169_v8 = vpop.f32.mrf.mxu0 }
 0x2b1   :  { %v689_v12 = vadd.f32 %v3169_v8, %v2983_v9 }
 0x2b2   :  { %v683_v10 = vpop.f32.mrf.mxu0 }
 0x2b3   :  { %v684_v11 = vadd.f32 %v2983_v9, %v683_v10 }
 0x2b5   :  { %3178 = vmatprep.mubr.msk.f32.mxu1 %vm698_vm1, %v684_v11 }
 0x2b6   :  { %3179 = vmatmul.mubr.msk.f32.vlgmr.msra.gmra.mxu1 %vm698_vm1, %v689_v12 }
 0x2b7   :  { %3193 = vmatpush3.msra.mxu1 %v872_v17 }
 0x2b8   :  { %3194 = vmatprep.subr.mxu1 %v871_v19 }
 0x2b9   :  { %3195 = vmatpush3.msra.mxu1 %v871_v19 }
 0x2ba   :  { %3196 = vmatprep.subr.mxu1 %v870_v28 }
 0x2bb   :  { %3197 = vmatpush3.msra.mxu1 %v870_v28 }
 0x2bc   :  { %3198 = vmatprep.subr.mxu1 %v869_v30 }
 0x2bd   :  { %3199 = vmatpush3.msra.mxu1 %v869_v30 }
 0x2be   :  { %3214 = vmatprep.subr.mxu1 %v882_v32 }
 0x376   :  { %v3180_v21 = vpop.f32.mrf.mxu1 }
 0x377   :  { %v777_v22 = vadd.f32 %v3180_v21, %v2986_v20 }
 0x378   :  { %v771_v23 = vpop.f32.mrf.mxu1 }
 0x379   :  { %v772_v24 = vadd.f32 %v2986_v20, %v771_v23  ;;  %v781_v26 = vmax.f32 %v777_v22, 0.0  ;;  %v886_v20 = vld [vmem:[#allocation20 + $0x10] sm:$0xff]  ;;  %v885_v23 = vld [vmem:[#allocation20 + $0x8] sm:$0xff] }
 0x37b   :  { %v780_v25 = vmax.f32 %v772_v24, 0.0  ;;  %v884_v24 = vld [vmem:[#allocation20] sm:$0xff] }
 0x37d   :  { %3189 = vmatprep.mubr.msk.f32.mxu0 %vm698_vm1, %v780_v25 }
 0x37e   :  { %3190 = vmatmul.mubr.msk.f32.vlgmr.msra.gmra.mxu0 %vm698_vm1, %v781_v26 }
 0x37f   :  { %3204 = vmatpush3.msra.mxu0 %v877_v18 }
 0x380   :  { %3205 = vmatprep.subr.mxu0 %v876_v27 }
 0x381   :  { %3206 = vmatpush3.msra.mxu0 %v876_v27 }
 0x382   :  { %3207 = vmatprep.subr.mxu0 %v875_v29 }
 0x383   :  { %3208 = vmatpush3.msra.mxu0 %v875_v29  ;;  %v3009_v29 = vld [vmem:[#allocation22] ss:$0 sm:$0xff] }
 0x384   :  { %3209 = vmatprep.subr.mxu0 %v874_v31 }
 0x385   :  { %3210 = vmatpush3.msra.mxu0 %v874_v31 }
 0x386   :  { %3225 = vmatprep.subr.mxu0 %v4309_v41 }
 0x43e   :  { %v3191_v33 = vpop.f32.mrf.mxu0 }
 0x43f   :  { %v4626_v37 = vadd.f32 %v3191_v33, %v2989_v34 }
 0x440   :  { %v860_v35 = vpop.f32.mrf.mxu0 }
 0x441   :  { %v4624_v36 = vadd.f32 %v2989_v34, %v860_v35 }
 0x443   :  { %3200 = vmatprep.mubr.msk.f32.mxu1 %vm698_vm1, %v4624_v36  ;;  %3211 = vmatprep.mubr.msk.f32.mxu0 %vm698_vm1, %v4624_v36 }
 0x444   :  { %3201 = vmatmul.mubr.msk.f32.vlgmr.msra.gmra.mxu1 %vm698_vm1, %v4626_v37  ;;  %3212 = vmatmul.mubr.msk.f32.vlgmr.msra.gmra.mxu0 %vm698_vm1, %v4626_v37 }
 0x445   :  { %3215 = vmatpush3.msra.mxu1 %v882_v32  ;;  %3222 = vmatprep.mubr.msk.f32.mxu1 %vm698_vm1, %v4624_v36 }
 0x446   :  { %3216 = vmatprep.subr.mxu1 %v881_v38  ;;  %3227 = vmatprep.mubr.msk.f32.mxu0 %vm4310_vm2, %v4309_v41 }
 0x447   :  { %3217 = vmatpush3.msra.mxu1 %v881_v38 }
 0x448   :  { %3218 = vmatprep.subr.mxu1 %v880_v39 }
 0x449   :  { %3219 = vmatpush3.msra.mxu1 %v880_v39 }
 0x44a   :  { %3220 = vmatprep.subr.mxu1 %v879_v40 }
 0x44b   :  { %3221 = vmatpush3.msra.mxu1 %v879_v40 }
 0x44c   :  { %3223 = vmatmul.mubr.msk.f32.vlgmr.msra.gmra.mxu1 %vm698_vm1, %v4626_v37  ;;  %3235 = vmatprep.subr.mxu1 %v4309_v41 }
 0x44d   :  { %3237 = vmatprep.mubr.msk.f32.mxu1 %vm4310_vm2, %v4309_v41 }
 0x504   :  { %v3202_v42 = vpop.f32.mrf.mxu1  ;;  %v3213_v43 = vpop.f32.mrf.mxu0 }
 0x505   :  { %v987_v51 = vadd.f32 %v3202_v42, %v2992_v44  ;;  %v1070_v52 = vadd.f32 %v3213_v43, %v2995_v45 }
 0x506   :  { %v981_v46 = vpop.f32.mrf.mxu1  ;;  %v1064_v47 = vpop.f32.mrf.mxu0 }
 0x507   :  { %v982_v48 = vadd.f32 %v2992_v44, %v981_v46  ;;  %v1065_v49 = vadd.f32 %v2995_v45, %v1064_v47  ;;  %v991_v55 = vmul.f32 0.17677669, %v987_v51  ;;  %v890_v51 = vld [vmem:[#allocation23 + $0x8] sm:$0xff] }
 0x509   :  { %v990_v50 = vmul.f32 0.17677669, %v982_v48  ;;  %3226 = vmatpush3.xpose.msk.msra.mxu0 %vm698_vm1, %v1065_v49 }
 0x50a   :  { %3230 = vmatprep.subr.mxu0 %v4309_v41 }
 0x50c   :  { %v3224_v53 = vpop.f32.mrf.mxu1  ;;  %3228 = vmatmul.mubr.msk.f32.vlgmr.msra.gmra.mxu0 %vm698_vm1, %v990_v50  ;;  %v892_v50 = vld [vmem:[#allocation23 + $0x18] sm:$0xff] }
 0x50d   :  { %3231 = vmatpush3.xpose.msk.msra.mxu0 %vm698_vm1, %v1070_v52  ;;  %3232 = vmatprep.mubr.msk.f32.mxu0 %vm4310_vm2, %v4309_v41  ;;  %v1151_v57 = vadd.f32 %v3224_v53, %v2998_v54  ;;  %v889_v52 = vld [vmem:[#allocation23] sm:$0xff] }
 0x50e   :  { %v1145_v56 = vpop.f32.mrf.mxu1  ;;  %3240 = vmatprep.subr.mxu0 %v4309_v41 }
 0x50f   :  { %v1146_v58 = vadd.f32 %v2998_v54, %v1145_v56 }
 0x510   :  { %3233 = vmatmul.mubr.msk.f32.vlgmr.msra.gmra.mxu0 %vm698_vm1, %v991_v55 }
 0x511   :  { %3236 = vmatpush3.msra.mxu1 %v1146_v58  ;;  %3241 = vmatpush3.msra.mxu0 %v1151_v57 }
 0x512   :  { %3242 = vmatprep.mubr.msk.f32.mxu0 %vm4310_vm2, %v4309_v41  ;;  %3245 = vmatprep.subr.mxu1 %v887_v15 }
 0x513   :  { %3256 = vmatprep.subr.mxu0 %v892_v50 }
 0x5cc   :  { %v1238_v60 = vpop.f32.mrf.mxu0 }
 0x5cd   :  { %v1239_v61 = vadd.f32 %v4657_v59, %v1238_v60 }
 0x5ce   :  { %v3229_v62 = vpop.f32.mrf.mxu0 }
 0x5cf   :  { %v1319_v0 = vsel %vm1318_vm3, %v1239_v61, -inf }
 0x5d0   :  { %1320 = vmax.xlane.f32.xlu0 %v1319_v0  ;;  %v1314_v1 = vpop.f32.mrf.mxu0 }
 0x5d1   :  { %v1315_v2 = vadd.f32 %v4660_v63, %v1314_v1 }
 0x5d2   :  { %v3234_v3 = vpop.f32.mrf.mxu0 }
 0x5d3   :  { %v1322_v4 = vsel %vm1318_vm3, %v1315_v2, -inf  ;;  %v3013_v3 = vld [vmem:[#allocation31] ss:$0 sm:$0xff] }
 0x5d4   :  { %1323 = vmax.xlane.f32.xlu0 %v1322_v4 }
 0x659   :  { %v1321_v5 = vpop.xlane.xlu0 %1320 }
 0x65a   :  { %v1325_v6 = vsub.f32 %v1239_v61, %v1321_v5  ;;  %v3012_v61 = vld [vmem:[#allocation29] ss:$0 sm:$0xff] }
 0x65c   :  { %v1327_v7 = vmul.f32 1.442695, %v1325_v6 }
 0x65d   :  { %v1324_v8 = vpop.xlane.xlu0 %1323 }
 0x65e   :  { %3459 = vpow2.f32 %v1327_v7  ;;  %v1326_v9 = vsub.f32 %v1315_v2, %v1324_v8  ;;  %v897_v7 = vld [vmem:[#allocation26 + $0x18] sm:$0xff]  ;;  %v896_v8 = vld [vmem:[#allocation26 + $0x10] sm:$0xff] }
 0x660   :  { %v1329_v10 = vmul.f32 1.442695, %v1326_v9  ;;  %v895_v9 = vld [vmem:[#allocation26 + $0x8] sm:$0xff] }
 0x662   :  { %3461 = vpow2.f32 %v1329_v10  ;;  %v894_v10 = vld [vmem:[#allocation26] sm:$0xff] }
 0x66b   :  { %v3460_v11 = vpop.eup %3459 }
 0x66c   :  { %v1331_v12 = vsel %vm1318_vm3, %v3460_v11, 0.0 }
 0x66d   :  { %1332 = vadd.xlane.f32.xlu1 %v1331_v12 }
 0x66f   :  { %v3462_v13 = vpop.eup %3461 }
 0x670   :  { %v1334_v14 = vsel %vm1318_vm3, %v3462_v13, 0.0 }
 0x671   :  { %1335 = vadd.xlane.f32.xlu1 %v1334_v14 }
 0x6f6   :  { %v1333_v16 = vpop.xlane.xlu1 %1332 }
 0x6f7   :  { %3463 = vrcp.f32 %v1333_v16 }
 0x6fa   :  { %v1336_v17 = vpop.xlane.xlu1 %1335 }
 0x6fb   :  { %3465 = vrcp.f32 %v1336_v17 }
 0x704   :  { %v3464_v18 = vpop.eup %3463 }
 0x705   :  { %v1339_v19 = vmul.f32 %v3464_v18, %v3460_v11  ;;  %v3014_v11 = vld [vmem:[#allocation25] ss:$0 sm:$0xff]  ;;  %v3017_v18 = vld [vmem:[#allocation28] ss:$0 sm:$0xff] }
 0x707   :  { %3238 = vmatmul.mubr.msk.f32.vlgmr.msra.gmra.mxu1 %vm1318_vm3, %v1339_v19 }
 0x708   :  { %v3466_v21 = vpop.eup %3465  ;;  %3246 = vmatpush3.msra.mxu1 %v887_v15 }
 0x709   :  { %v1340_v22 = vmul.f32 %v3466_v21, %v3462_v13  ;;  %3247 = vmatprep.subr.mxu1 %v886_v20 }
 0x70a   :  { %3248 = vmatpush3.msra.mxu1 %v886_v20 }
 0x70b   :  { %3243 = vmatmul.mubr.msk.f32.vlgmr.msra.gmra.mxu0 %vm1318_vm3, %v1340_v22  ;;  %3249 = vmatprep.subr.mxu1 %v885_v23 }
 0x70c   :  { %3250 = vmatpush3.msra.mxu1 %v885_v23  ;;  %3257 = vmatpush3.msra.mxu0 %v892_v50 }
 0x70d   :  { %3251 = vmatprep.subr.mxu1 %v884_v24 }
 0x70e   :  { %3252 = vmatpush3.msra.mxu1 %v884_v24 }
 0x70f   :  { %3267 = vmatprep.subr.mxu1 %v897_v7 }
 0x7c7   :  { %v1410_v25 = vpop.f32.mrf.mxu1 }
 0x7c8   :  { %3253 = vmatprep.mubr.msk.f32.mxu1 %vm698_vm1, %v1410_v25 }
 0x7c9   :  { %v3239_v26 = vpop.f32.mrf.mxu1 }
 0x7cb   :  { %v1483_v27 = vpop.f32.mrf.mxu0 }
 0x7cc   :  { %3254 = vmatmul.mubr.msk.f32.vlgmr.msra.gmra.mxu1 %vm698_vm1, %v1483_v27 }
 0x7cd   :  { %v3244_v28 = vpop.f32.mrf.mxu0  ;;  %3268 = vmatpush3.msra.mxu1 %v897_v7 }
 0x7ce   :  { %3269 = vmatprep.subr.mxu1 %v896_v8 }
 0x7cf   :  { %3270 = vmatpush3.msra.mxu1 %v896_v8 }
 0x7d0   :  { %3271 = vmatprep.subr.mxu1 %v895_v9 }
 0x7d1   :  { %3272 = vmatpush3.msra.mxu1 %v895_v9 }
 0x7d2   :  { %3273 = vmatprep.subr.mxu1 %v894_v10 }
 0x7d3   :  { %3274 = vmatpush3.msra.mxu1 %v894_v10 }
 0x88c   :  { %v3255_v30 = vpop.f32.mrf.mxu1 }
 0x88d   :  { %v1571_v31 = vadd.f32 %v3255_v30, %v3009_v29 }
 0x88e   :  { %v1565_v32 = vpop.f32.mrf.mxu1 }
 0x88f   :  { %v1566_v33 = vadd.f32 %v3009_v29, %v1565_v32  ;;  %v1575_v34 = vadd.f32 %v1571_v31, %v4626_v37 }
 0x891   :  { %v1579_v35 = vsel %vm698_vm1, %v1575_v34, 0.0  ;;  %v1574_v38 = vadd.f32 %v1566_v33, %v4624_v36  ;;  %v891_v36 = vld [vmem:[#allocation23 + $0x10] sm:$0xff] }
 0x892   :  { %1580 = vadd.xlane.f32.xlu1 %v1579_v35  ;;  %3258 = vmatprep.subr.mxu0 %v891_v36 }
 0x893   :  { %v1576_v39 = vsel %vm698_vm1, %v1574_v38, 0.0  ;;  %3259 = vmatpush3.msra.mxu0 %v891_v36 }
 0x894   :  { %1577 = vadd.xlane.f32.xlu0 %v1576_v39  ;;  %3260 = vmatprep.subr.mxu0 %v890_v51  ;;  %v1842_v39 = vld [vmem:[#allocation35 + $0x18] sm:$0xff] }
 0x895   :  { %3261 = vmatpush3.msra.mxu0 %v890_v51 }
 0x896   :  { %3262 = vmatprep.subr.mxu0 %v889_v52 }
 0x897   :  { %3263 = vmatpush3.msra.mxu0 %v889_v52 }
 0x898   :  { %3278 = vmatprep.subr.mxu0 %v1842_v39 }
 0x91b   :  { %v1581_v40 = vpop.xlane.xlu1 %1580 }
 0x91c   :  { %v1584_v42 = vmul.f32 0.03125, %v1581_v40  ;;  %v1847_v40 = vld [vmem:[#allocation38 + $0x18] sm:$0xff] }
 0x91d   :  { %v1578_v43 = vpop.xlane.xlu0 %1577  ;;  %3289 = vmatprep.subr.mxu1 %v1847_v40 }
 0x91e   :  { %v1586_v44 = vsub.f32 %v1575_v34, %v1584_v42  ;;  %v1583_v45 = vmul.f32 0.03125, %v1578_v43  ;;  %v1841_v42 = vld [vmem:[#allocation35 + $0x10] sm:$0xff] }
 0x91f   :  { %v1846_v43 = vld [vmem:[#allocation38 + $0x10] sm:$0xff] }
 0x920   :  { %v1585_v46 = vsub.f32 %v1574_v38, %v1583_v45  ;;  %v1588_v47 = vmul.f32 %v1586_v44, %v1586_v44  ;;  %v1845_v45 = vld [vmem:[#allocation38 + $0x8] sm:$0xff] }
 0x922   :  { %v1592_v48 = vsel %vm698_vm1, %v1588_v47, 0.0  ;;  %v1587_v49 = vmul.f32 %v1585_v46, %v1585_v46  ;;  %v1844_v47 = vld [vmem:[#allocation38] sm:$0xff] }
 0x923   :  { %1593 = vadd.xlane.f32.xlu1 %v1592_v48  ;;  %v1852_v48 = vld [vmem:[%s4819_s8 + $0x18] sm:$0xff] }
 0x924   :  { %v1589_v37 = vsel %vm698_vm1, %v1587_v49, 0.0 }
 0x925   :  { %1590 = vadd.xlane.f32.xlu0 %v1589_v37 }
 0x9ac   :  { %v1594_v53 = vpop.xlane.xlu1 %1593 }
 0x9ad   :  { %v1596_v54 = vmul.f32 0.03125, %v1594_v53 }
 0x9ae   :  { %v1591_v55 = vpop.xlane.xlu0 %1590 }
 0x9af   :  { %v1598_v56 = vadd.f32 1e-05, %v1596_v54  ;;  %v1595_v57 = vmul.f32 0.03125, %v1591_v55  ;;  %v3020_v54 = vld [vmem:[#allocation32] ss:$0 sm:$0xff] }
 0x9b1   :  { %3467 = vrsqrt.f32 %v1598_v56  ;;  %v1597_v58 = vadd.f32 1e-05, %v1595_v57 }
 0x9b3   :  { %3469 = vrsqrt.f32 %v1597_v58 }
 0x9be   :  { %v3468_v60 = vpop.eup %3467 }
 0x9bf   :  { %v1602_v62 = vmul.f32 %v3468_v60, %v1586_v44  ;;  %v1840_v44 = vld [vmem:[#allocation35 + $0x8] sm:$0xff]  ;;  %v3021_v60 = vld [vmem:[#allocation34] ss:$0 sm:$0xff] }
 0x9c0   :  { %v3470_v0 = vpop.eup %3469 }
 0x9c1   :  { %v1601_v1 = vmul.f32 %v3470_v0, %v1585_v46  ;;  %v1610_v2 = vmul.f32 %v3012_v61, %v1602_v62  ;;  %v1839_v46 = vld [vmem:[#allocation35] sm:$0xff] }
 0x9c3   :  { %v1609_v4 = vmul.f32 %v3012_v61, %v1601_v1  ;;  %v1618_v6 = vadd.f32 %v3013_v3, %v1610_v2  ;;  %v1851_v1 = vld [vmem:[%s4819_s8 + $0x10] sm:$0xff]  ;;  %v1850_v2 = vld [vmem:[%s4819_s8 + $0x8] sm:$0xff] }
 0x9c5   :  { %v1617_v5 = vadd.f32 %v3013_v3, %v1609_v4  ;;  %v1849_v3 = vld [vmem:[%s4819_s8] sm:$0xff]  ;;  %v3022_v4 = vld [vmem:[#allocation37] ss:$0 sm:$0xff] }
 0x9c7   :  { %3264 = vmatprep.mubr.msk.f32.mxu0 %vm698_vm1, %v1617_v5 }
 0x9c8   :  { %3265 = vmatmul.mubr.msk.f32.vlgmr.msra.gmra.mxu0 %vm698_vm1, %v1618_v6 }
 0x9c9   :  { %3279 = vmatpush3.msra.mxu0 %v1842_v39 }
 0x9ca   :  { %3280 = vmatprep.subr.mxu0 %v1841_v42 }
 0x9cb   :  { %3281 = vmatpush3.msra.mxu0 %v1841_v42 }
 0x9cc   :  { %3282 = vmatprep.subr.mxu0 %v1840_v44 }
 0x9cd   :  { %3283 = vmatpush3.msra.mxu0 %v1840_v44 }
 0x9ce   :  { %3284 = vmatprep.subr.mxu0 %v1839_v46 }
 0x9cf   :  { %3285 = vmatpush3.msra.mxu0 %v1839_v46  ;;  %v1856_v46 = vld [vmem:[#allocation43 + $0x10] sm:$0xff] }
 0x9d0   :  { %3300 = vmatprep.subr.mxu0 %v1852_v48 }
 0xa88   :  { %v3266_v12 = vpop.f32.mrf.mxu0 }
 0xa89   :  { %v1703_v13 = vadd.f32 %v3266_v12, %v3014_v11 }
 0xa8a   :  { %v1697_v14 = vpop.f32.mrf.mxu0 }
 0xa8b   :  { %v1698_v15 = vadd.f32 %v3014_v11, %v1697_v14  ;;  %v1707_v17 = vmax.f32 %v1703_v13, 0.0 }
 0xa8d   :  { %v1706_v16 = vmax.f32 %v1698_v15, 0.0 }
 0xa8f   :  { %3275 = vmatprep.mubr.msk.f32.mxu1 %vm698_vm1, %v1706_v16  ;;  %v3028_v16 = vld [vmem:[#allocation41] ss:$0 sm:$0xff] }
 0xa90   :  { %3276 = vmatmul.mubr.msk.f32.vlgmr.msra.gmra.mxu1 %vm698_vm1, %v1707_v17 }
 0xa91   :  { %3290 = vmatpush3.msra.mxu1 %v1847_v40 }
 0xa92   :  { %3291 = vmatprep.subr.mxu1 %v1846_v43 }
 0xa93   :  { %3292 = vmatpush3.msra.mxu1 %v1846_v43 }
 0xa94   :  { %3293 = vmatprep.subr.mxu1 %v1845_v45 }
 0xa95   :  { %3294 = vmatpush3.msra.mxu1 %v1845_v45 }
 0xa96   :  { %3295 = vmatprep.subr.mxu1 %v1844_v47 }
 0xa97   :  { %3296 = vmatpush3.msra.mxu1 %v1844_v47  ;;  %v1855_v47 = vld [vmem:[#allocation43 + $0x8] sm:$0xff] }
 0xa98   :  { %3311 = vmatprep.subr.mxu1 %v4309_v41 }
 0xb50   :  { %v3277_v19 = vpop.f32.mrf.mxu1 }
 0xb51   :  { %v1792_v20 = vadd.f32 %v3277_v19, %v3017_v18 }
 0xb52   :  { %v1786_v21 = vpop.f32.mrf.mxu1 }
 0xb53   :  { %v1787_v22 = vadd.f32 %v3017_v18, %v1786_v21  ;;  %v1796_v23 = vadd.f32 %v1792_v20, %v1618_v6 }
 0xb55   :  { %v1800_v24 = vsel %vm698_vm1, %v1796_v23, 0.0  ;;  %v1795_v25 = vadd.f32 %v1787_v22, %v1617_v5  ;;  %v3025_v5 = vld [vmem:[#allocation40] ss:$0 sm:$0xff] }
 0xb56   :  { %1801 = vadd.xlane.f32.xlu1 %v1800_v24 }
 0xb57   :  { %v1797_v26 = vsel %vm698_vm1, %v1795_v25, 0.0 }
 0xb58   :  { %1798 = vadd.xlane.f32.xlu0 %v1797_v26 }
 0xbdf   :  { %v1802_v27 = vpop.xlane.xlu1 %1801 }
 0xbe0   :  { %v1804_v28 = vmul.f32 0.03125, %v1802_v27 }
 0xbe1   :  { %v1799_v29 = vpop.xlane.xlu0 %1798 }
 0xbe2   :  { %v1806_v30 = vsub.f32 %v1796_v23, %v1804_v28  ;;  %v1803_v31 = vmul.f32 0.03125, %v1799_v29 }
 0xbe4   :  { %v1805_v32 = vsub.f32 %v1795_v25, %v1803_v31  ;;  %v1808_v33 = vmul.f32 %v1806_v30, %v1806_v30 }
 0xbe6   :  { %v1812_v34 = vsel %vm698_vm1, %v1808_v33, 0.0  ;;  %v1807_v35 = vmul.f32 %v1805_v32, %v1805_v32 }
 0xbe7   :  { %1813 = vadd.xlane.f32.xlu1 %v1812_v34 }
 0xbe8   :  { %v1809_v38 = vsel %vm698_vm1, %v1807_v35, 0.0 }
 0xbe9   :  { %1810 = vadd.xlane.f32.xlu0 %v1809_v38  ;;  %v1857_v38 = vld [vmem:[#allocation43 + $0x18] sm:$0xff] }
 0xc70   :  { %v1814_v49 = vpop.xlane.xlu1 %1813 }
 0xc71   :  { %v1816_v37 = vmul.f32 0.03125, %v1814_v49 }
 0xc72   :  { %v1811_v50 = vpop.xlane.xlu0 %1810 }
 0xc73   :  { %v1818_v36 = vadd.f32 1e-05, %v1816_v37  ;;  %v1815_v51 = vmul.f32 0.03125, %v1811_v50 }
 0xc75   :  { %3471 = vrsqrt.f32 %v1818_v36  ;;  %v1817_v52 = vadd.f32 1e-05, %v1815_v51  ;;  %v3037_v51 = vld [vmem:[#allocation44] ss:$0 sm:$0xff] }
 0xc77   :  { %3473 = vrsqrt.f32 %v1817_v52 }
 0xc82   :  { %v3472_v53 = vpop.eup %3471 }
 0xc83   :  { %v1822_v55 = vmul.f32 %v3472_v53, %v1806_v30 }
 0xc84   :  { %v3474_v56 = vpop.eup %3473 }
 0xc85   :  { %v1821_v57 = vmul.f32 %v3474_v56, %v1805_v32  ;;  %v1830_v58 = vmul.f32 %v3020_v54, %v1822_v55 }
 0xc87   :  { %v1829_v61 = vmul.f32 %v3020_v54, %v1821_v57  ;;  %v4689_v0 = vadd.f32 %v3021_v60, %v1830_v58 }
 0xc89   :  { %v4687_v62 = vadd.f32 %v3021_v60, %v1829_v61 }
 0xc8b   :  { %3286 = vmatprep.mubr.msk.f32.mxu0 %vm698_vm1, %v4687_v62  ;;  %3297 = vmatprep.mubr.msk.f32.mxu1 %vm698_vm1, %v4687_v62 }
 0xc8c   :  { %3287 = vmatmul.mubr.msk.f32.vlgmr.msra.gmra.mxu0 %vm698_vm1, %v4689_v0  ;;  %3298 = vmatmul.mubr.msk.f32.vlgmr.msra.gmra.mxu1 %vm698_vm1, %v4689_v0 }
 0xc8d   :  { %3301 = vmatpush3.msra.mxu0 %v1852_v48  ;;  %3308 = vmatprep.mubr.msk.f32.mxu0 %vm698_vm1, %v4687_v62  ;;  %v1854_v48 = vld [vmem:[#allocation43] sm:$0xff] }
 0xc8e   :  { %3302 = vmatprep.subr.mxu0 %v1851_v1  ;;  %3313 = vmatprep.mubr.msk.f32.mxu1 %vm4310_vm2, %v4309_v41 }
 0xc8f   :  { %3303 = vmatpush3.msra.mxu0 %v1851_v1 }
 0xc90   :  { %3304 = vmatprep.subr.mxu0 %v1850_v2 }
 0xc91   :  { %3305 = vmatpush3.msra.mxu0 %v1850_v2 }
 0xc92   :  { %3306 = vmatprep.subr.mxu0 %v1849_v3 }
 0xc93   :  { %3307 = vmatpush3.msra.mxu0 %v1849_v3 }
 0xc94   :  { %3309 = vmatmul.mubr.msk.f32.vlgmr.msra.gmra.mxu0 %vm698_vm1, %v4689_v0  ;;  %3316 = vmatprep.subr.mxu0 %v4309_v41 }
 0xc95   :  { %3318 = vmatprep.mubr.msk.f32.mxu0 %vm4310_vm2, %v4309_v41 }
 0xd4c   :  { %v3288_v6 = vpop.f32.mrf.mxu0  ;;  %v3299_v7 = vpop.f32.mrf.mxu1 }
 0xd4d   :  { %v1957_v8 = vadd.f32 %v3288_v6, %v3022_v4  ;;  %v2040_v9 = vadd.f32 %v3299_v7, %v3025_v5 }
 0xd4e   :  { %v1951_v10 = vpop.f32.mrf.mxu0  ;;  %v2034_v11 = vpop.f32.mrf.mxu1 }
 0xd4f   :  { %v1961_v12 = vmul.f32 0.17677669, %v1957_v8  ;;  %v1952_v13 = vadd.f32 %v3022_v4, %v1951_v10  ;;  %v2035_v14 = vadd.f32 %v3025_v5, %v2034_v11  ;;  %3317 = vmatpush3.xpose.msk.msra.mxu0 %vm698_vm1, %v2040_v9  ;;  %v1862_v9 = vld [vmem:[#allocation46 + $0x18] sm:$0xff]  ;;  %v1860_v10 = vld [vmem:[#allocation46 + $0x8] sm:$0xff]  ;;  %v1859_v11 = vld [vmem:[#allocation46] sm:$0xff] }
 0xd50   :  { %3326 = vmatprep.subr.mxu0 %v4309_v41 }
 0xd51   :  { %v1960_v15 = vmul.f32 0.17677669, %v1952_v13  ;;  %3312 = vmatpush3.xpose.msk.msra.mxu1 %vm698_vm1, %v2035_v14 }
 0xd52   :  { %3319 = vmatmul.mubr.msk.f32.vlgmr.msra.gmra.mxu0 %vm698_vm1, %v1961_v12  ;;  %3321 = vmatprep.subr.mxu1 %v4309_v41 }
 0xd53   :  { %3328 = vmatprep.mubr.msk.f32.mxu0 %vm4310_vm2, %v4309_v41 }
 0xd54   :  { %v3310_v17 = vpop.f32.mrf.mxu0  ;;  %3314 = vmatmul.mubr.msk.f32.vlgmr.msra.gmra.mxu1 %vm698_vm1, %v1960_v15 }
 0xd55   :  { %v2121_v18 = vadd.f32 %v3310_v17, %v3028_v16  ;;  %3323 = vmatprep.mubr.msk.f32.mxu1 %vm4310_vm2, %v4309_v41 }
 0xd56   :  { %v2115_v19 = vpop.f32.mrf.mxu0 }
 0xd57   :  { %v2116_v20 = vadd.f32 %v3028_v16, %v2115_v19  ;;  %3327 = vmatpush3.msra.mxu0 %v2121_v18  ;;  %v3040_v19 = vld [vmem:[#allocation52] ss:$0 sm:$0xff] }
 0xd58   :  { %3342 = vmatprep.subr.mxu0 %v1862_v9 }
 0xd59   :  { %3322 = vmatpush3.msra.mxu1 %v2116_v20 }
 0xd5a   :  { %3331 = vmatprep.subr.mxu1 %v1857_v38 }
 0xe12   :  { %v2272_v21 = vpop.f32.mrf.mxu0 }
 0xe13   :  { %v2273_v22 = vadd.f32 %v4660_v63, %v2272_v21 }
 0xe14   :  { %v2196_v23 = vpop.f32.mrf.mxu1  ;;  %v3320_v24 = vpop.f32.mrf.mxu0 }
 0xe15   :  { %v2197_v25 = vadd.f32 %v4657_v59, %v2196_v23  ;;  %v2279_v26 = vsel %vm1318_vm3, %v2273_v22, -inf  ;;  %v3041_v24 = vld [vmem:[%s4820_s7] ss:$0 sm:$0xff] }
 0xe16   :  { %2280 = vmax.xlane.f32.xlu1 %v2279_v26  ;;  %v3315_v27 = vpop.f32.mrf.mxu1 }
 0xe17   :  { %v2276_v28 = vsel %vm1318_vm3, %v2197_v25, -inf }
 0xe18   :  { %2277 = vmax.xlane.f32.xlu0 %v2276_v28  ;;  %v1867_v28 = vld [vmem:[#allocation49 + $0x18] sm:$0xff] }
 0xe9f   :  { %v2281_v29 = vpop.xlane.xlu1 %2280 }
 0xea0   :  { %v2283_v41 = vsub.f32 %v2273_v22, %v2281_v29  ;;  %v1866_v29 = vld [vmem:[#allocation49 + $0x10] sm:$0xff] }
 0xea1   :  { %v2278_v30 = vpop.xlane.xlu0 %2277 }
 0xea2   :  { %v2286_v31 = vmul.f32 1.442695, %v2283_v41  ;;  %v2282_v32 = vsub.f32 %v2197_v25, %v2278_v30  ;;  %v1865_v41 = vld [vmem:[#allocation49 + $0x8] sm:$0xff]  ;;  %v1864_v30 = vld [vmem:[#allocation49] sm:$0xff] }
 0xea4   :  { %3475 = vpow2.f32 %v2286_v31  ;;  %v2284_v33 = vmul.f32 1.442695, %v2282_v32  ;;  %v3042_v31 = vld [vmem:[#allocation47] ss:$0 sm:$0xff] }
 0xea6   :  { %3477 = vpow2.f32 %v2284_v33 }
 0xeb1   :  { %v3476_v63 = vpop.eup %3475 }
 0xeb2   :  { %v2291_v34 = vsel %vm1318_vm3, %v3476_v63, 0.0 }
 0xeb3   :  { %v3478_v35 = vpop.eup %3477  ;;  %2292 = vadd.xlane.f32.xlu1 %v2291_v34 }
 0xeb4   :  { %v2288_v59 = vsel %vm1318_vm3, %v3478_v35, 0.0 }
 0xeb5   :  { %2289 = vadd.xlane.f32.xlu0 %v2288_v59 }
 0xf3c   :  { %v2293_v39 = vpop.xlane.xlu1 %2292 }
 0xf3d   :  { %3479 = vrcp.f32 %v2293_v39 }
 0xf3e   :  { %v2290_v40 = vpop.xlane.xlu0 %2289 }
 0xf3f   :  { %3481 = vrcp.f32 %v2290_v40 }
 0xf4a   :  { %v3480_v42 = vpop.eup %3479 }
 0xf4b   :  { %v2297_v43 = vmul.f32 %v3480_v42, %v3476_v63 }
 0xf4c   :  { %v3482_v44 = vpop.eup %3481 }
 0xf4d   :  { %3329 = vmatmul.mubr.msk.f32.vlgmr.msra.gmra.mxu0 %vm1318_vm3, %v2297_v43  ;;  %v2296_v45 = vmul.f32 %v3482_v44, %v3478_v35 }
 0xf4e   :  { %3343 = vmatpush3.msra.mxu0 %v1862_v9  ;;  %v3049_v9 = vld [vmem:[%s4822_s11] ss:$0 sm:$0xff] }
 0xf4f   :  { %3324 = vmatmul.mubr.msk.f32.vlgmr.msra.gmra.mxu1 %vm1318_vm3, %v2296_v45 }
 0xf50   :  { %3332 = vmatpush3.msra.mxu1 %v1857_v38  ;;  %v3045_v38 = vld [vmem:[#allocation50] ss:$0 sm:$0xff] }
 0xf51   :  { %3333 = vmatprep.subr.mxu1 %v1856_v46 }
 0xf52   :  { %3334 = vmatpush3.msra.mxu1 %v1856_v46 }
 0xf53   :  { %3335 = vmatprep.subr.mxu1 %v1855_v47 }
 0xf54   :  { %3336 = vmatpush3.msra.mxu1 %v1855_v47 }
 0xf55   :  { %3337 = vmatprep.subr.mxu1 %v1854_v48 }
 0xf56   :  { %3338 = vmatpush3.msra.mxu1 %v1854_v48 }
 0xf57   :  { %3353 = vmatprep.subr.mxu1 %v1867_v28 }
0x100d   :  { %v2440_v49 = vpop.f32.mrf.mxu0 }
0x100f   :  { %v2367_v37 = vpop.f32.mrf.mxu1  ;;  %v3330_v50 = vpop.f32.mrf.mxu0 }
0x1010   :  { %3339 = vmatprep.mubr.msk.f32.mxu1 %vm698_vm1, %v2367_v37 }
0x1011   :  { %v3325_v36 = vpop.f32.mrf.mxu1  ;;  %3340 = vmatmul.mubr.msk.f32.vlgmr.msra.gmra.mxu1 %vm698_vm1, %v2440_v49 }
0x1012   :  { %3354 = vmatpush3.msra.mxu1 %v1867_v28 }
0x1013   :  { %3355 = vmatprep.subr.mxu1 %v1866_v29 }
0x1014   :  { %3356 = vmatpush3.msra.mxu1 %v1866_v29 }
0x1015   :  { %3357 = vmatprep.subr.mxu1 %v1865_v41 }
0x1016   :  { %3358 = vmatpush3.msra.mxu1 %v1865_v41 }
0x1017   :  { %3359 = vmatprep.subr.mxu1 %v1864_v30 }
0x1018   :  { %3360 = vmatpush3.msra.mxu1 %v1864_v30 }
0x10d1   :  { %v3341_v52 = vpop.f32.mrf.mxu1 }
0x10d2   :  { %v2528_v53 = vadd.f32 %v3341_v52, %v3037_v51 }
0x10d3   :  { %v2522_v54 = vpop.f32.mrf.mxu1 }
0x10d4   :  { %v2523_v55 = vadd.f32 %v3037_v51, %v2522_v54  ;;  %v2532_v56 = vadd.f32 %v2528_v53, %v4689_v0 }
0x10d6   :  { %v2536_v57 = vsel %vm698_vm1, %v2532_v56, 0.0  ;;  %v2531_v58 = vadd.f32 %v2523_v55, %v4687_v62  ;;  %v1861_v62 = vld [vmem:[#allocation46 + $0x10] sm:$0xff] }
0x10d7   :  { %2537 = vadd.xlane.f32.xlu1 %v2536_v57  ;;  %3344 = vmatprep.subr.mxu0 %v1861_v62  ;;  %v2797_v57 = vld [vmem:[%s4521_s3 + $0x10] sm:$0xff] }
0x10d8   :  { %v2533_v60 = vsel %vm698_vm1, %v2531_v58, 0.0  ;;  %3345 = vmatpush3.msra.mxu0 %v1861_v62 }
0x10d9   :  { %2534 = vadd.xlane.f32.xlu0 %v2533_v60  ;;  %3346 = vmatprep.subr.mxu0 %v1860_v10  ;;  %v2795_v60 = vld [vmem:[%s4521_s3] sm:$0xff] }
0x10da   :  { %3347 = vmatpush3.msra.mxu0 %v1860_v10 }
0x10db   :  { %3348 = vmatprep.subr.mxu0 %v1859_v11 }
0x10dc   :  { %3349 = vmatpush3.msra.mxu0 %v1859_v11 }
0x1160   :  { %v2538_v61 = vpop.xlane.xlu1 %2537 }
0x1161   :  { %v2540_v1 = vmul.f32 0.03125, %v2538_v61 }
0x1162   :  { %v2535_v2 = vpop.xlane.xlu0 %2534 }
0x1163   :  { %v2542_v3 = vsub.f32 %v2532_v56, %v2540_v1  ;;  %v2539_v4 = vmul.f32 0.03125, %v2535_v2  ;;  %v2798_v56 = vld [vmem:[%s4521_s3 + $0x18] sm:$0xff] }
0x1164   :  { %3364 = vmatprep.subr.mxu0 %v2798_v56 }
0x1165   :  { %v2541_v5 = vsub.f32 %v2531_v58, %v2539_v4  ;;  %v2544_v6 = vmul.f32 %v2542_v3, %v2542_v3  ;;  %v2796_v58 = vld [vmem:[%s4521_s3 + $0x8] sm:$0xff]  ;;  %s4311_s3 = smov [#allocation53]  }
0x1166   :  { %s2896_s6 = sshll.u32 %s4311_s3, 4  ;;  %s2897_s6 = int_to_ptr.vmem [resolvable:$true] %s2896_s6 }
0x1167   :  { %v2548_v7 = vsel %vm698_vm1, %v2544_v6, 0.0  ;;  %v2543_v8 = vmul.f32 %v2541_v5, %v2541_v5  ;;  %s4151_s15 = scalar_lea.vmem %s2897_s6, 256  ;;  %p4156_p12 = scmp.lt.s32.totalorder %s2897_s6, %s2897_s6 }
0x1168   :  { %2549 = vadd.xlane.f32.xlu1 %v2548_v7  ;;  %v3048_v7 = vld [vmem:[%s4821_s10] ss:$0 sm:$0xff]  ;;  %p4152_p11 = scmp.ne.s32.totalorder %s2897_s6, %s4151_s15  ;;  %p4157_p13 = scmp.lt.s32.totalorder %s4151_s15, %s4151_s15 }
0x1169   :  { %v2545_v0 = vsel %vm698_vm1, %v2543_v8, 0.0 }
0x116a   :  { %2546 = vadd.xlane.f32.xlu0 %v2545_v0  ;;  %p4158_p0 = por %p4157_p13, %p4156_p12 }
0x116c   :  { %p4159_p1 = pnand %p4158_p0, %p4152_p11 }
0x11f1   :  { %v2550_v12 = vpop.xlane.xlu1 %2549 }
0x11f2   :  { %v2552_v13 = vmul.f32 0.03125, %v2550_v12 }
0x11f3   :  { %v2547_v14 = vpop.xlane.xlu0 %2546 }
0x11f4   :  { %v2554_v15 = vadd.f32 1e-05, %v2552_v13  ;;  %v2551_v16 = vmul.f32 0.03125, %v2547_v14 }
0x11f6   :  { %3483 = vrsqrt.f32 %v2554_v15  ;;  %v2553_v17 = vadd.f32 1e-05, %v2551_v16 }
0x11f8   :  { %3485 = vrsqrt.f32 %v2553_v17 }
0x1203   :  { %v3484_v18 = vpop.eup %3483 }
0x1204   :  { %v2558_v20 = vmul.f32 %v3484_v18, %v2542_v3 }
0x1205   :  { %v3486_v21 = vpop.eup %3485 }
0x1206   :  { %v2557_v22 = vmul.f32 %v3486_v21, %v2541_v5  ;;  %v2566_v23 = vmul.f32 %v3040_v19, %v2558_v20 }
0x1208   :  { %v2565_v25 = vmul.f32 %v3040_v19, %v2557_v22  ;;  %v2574_v27 = vadd.f32 %v3041_v24, %v2566_v23 }
0x120a   :  { %v2573_v26 = vadd.f32 %v3041_v24, %v2565_v25 }
0x120c   :  { %3350 = vmatprep.mubr.msk.f32.mxu0 %vm698_vm1, %v2573_v26 }
0x120d   :  { %3351 = vmatmul.mubr.msk.f32.vlgmr.msra.gmra.mxu0 %vm698_vm1, %v2574_v27 }
0x120e   :  { %3365 = vmatpush3.msra.mxu0 %v2798_v56 }
0x120f   :  { %3366 = vmatprep.subr.mxu0 %v2797_v57 }
0x1210   :  { %3367 = vmatpush3.msra.mxu0 %v2797_v57 }
0x1211   :  { %3368 = vmatprep.subr.mxu0 %v2796_v58 }
0x1212   :  { %3369 = vmatpush3.msra.mxu0 %v2796_v58 }
0x1213   :  { %3370 = vmatprep.subr.mxu0 %v2795_v60 }
0x1214   :  { %3371 = vmatpush3.msra.mxu0 %v2795_v60 }
0x12cd   :  { %v3352_v32 = vpop.f32.mrf.mxu0 }
0x12ce   :  { %v2659_v33 = vadd.f32 %v3352_v32, %v3042_v31 }
0x12cf   :  { %v2653_v63 = vpop.f32.mrf.mxu0 }
0x12d0   :  { %v2654_v34 = vadd.f32 %v3042_v31, %v2653_v63  ;;  %v2663_v59 = vmax.f32 %v2659_v33, 0.0 }
0x12d2   :  { %v2662_v35 = vmax.f32 %v2654_v34, 0.0 }
0x12d4   :  { %3361 = vmatprep.mubr.msk.f32.mxu1 %vm698_vm1, %v2662_v35 }
0x12d5   :  { %3362 = vmatmul.mubr.msk.f32.vlgmr.msra.gmra.mxu1 %vm698_vm1, %v2663_v59 }
0x1395   :  { %v3363_v39 = vpop.f32.mrf.mxu1 }
0x1396   :  { %v2748_v40 = vadd.f32 %v3363_v39, %v3045_v38 }
0x1397   :  { %v2742_v42 = vpop.f32.mrf.mxu1 }
0x1398   :  { %v2743_v43 = vadd.f32 %v3045_v38, %v2742_v42  ;;  %v2752_v44 = vadd.f32 %v2748_v40, %v2574_v27 }
0x139a   :  { %v2756_v45 = vsel %vm698_vm1, %v2752_v44, 0.0  ;;  %v2751_v46 = vadd.f32 %v2743_v43, %v2573_v26 }
0x139b   :  { %2757 = vadd.xlane.f32.xlu1 %v2756_v45 }
0x139c   :  { %v2753_v47 = vsel %vm698_vm1, %v2751_v46, 0.0 }
0x139d   :  { %2754 = vadd.xlane.f32.xlu0 %v2753_v47 }
0x1424   :  { %v2758_v48 = vpop.xlane.xlu1 %2757 }
0x1425   :  { %v2760_v49 = vmul.f32 0.03125, %v2758_v48 }
0x1426   :  { %v2755_v37 = vpop.xlane.xlu0 %2754 }
0x1427   :  { %v2762_v50 = vsub.f32 %v2752_v44, %v2760_v49  ;;  %v2759_v36 = vmul.f32 0.03125, %v2755_v37 }
0x1429   :  { %v2761_v51 = vsub.f32 %v2751_v46, %v2759_v36  ;;  %v2764_v52 = vmul.f32 %v2762_v50, %v2762_v50 }
0x142b   :  { %v2768_v53 = vsel %vm698_vm1, %v2764_v52, 0.0  ;;  %v2763_v54 = vmul.f32 %v2761_v51, %v2761_v51 }
0x142c   :  { %2769 = vadd.xlane.f32.xlu1 %v2768_v53 }
0x142d   :  { %v2765_v55 = vsel %vm698_vm1, %v2763_v54, 0.0 }
0x142e   :  { %2766 = vadd.xlane.f32.xlu0 %v2765_v55 }
0x14b5   :  { %v2770_v61 = vpop.xlane.xlu1 %2769 }
0x14b6   :  { %v2772_v1 = vmul.f32 0.03125, %v2770_v61 }
0x14b7   :  { %v2767_v2 = vpop.xlane.xlu0 %2766 }
0x14b8   :  { %v2774_v3 = vadd.f32 1e-05, %v2772_v1  ;;  %v2771_v4 = vmul.f32 0.03125, %v2767_v2 }
0x14ba   :  { %3487 = vrsqrt.f32 %v2774_v3  ;;  %v2773_v5 = vadd.f32 1e-05, %v2771_v4 }
0x14bc   :  { %3489 = vrsqrt.f32 %v2773_v5 }
0x14c7   :  { %v3488_v6 = vpop.eup %3487 }
0x14c8   :  { %v2778_v8 = vmul.f32 %v3488_v6, %v2762_v50 }
0x14c9   :  { %v3490_v0 = vpop.eup %3489 }
0x14ca   :  { %v2777_v62 = vmul.f32 %v3490_v0, %v2761_v51  ;;  %v2786_v10 = vmul.f32 %v3048_v7, %v2778_v8 }
0x14cc   :  { %v2785_v11 = vmul.f32 %v3048_v7, %v2777_v62  ;;  %v2794_v12 = vadd.f32 %v3049_v9, %v2786_v10 }
0x14ce   :  { %v2793_v13 = vadd.f32 %v3049_v9, %v2785_v11  ;;  %2801 = vst.msk [vmem:[#allocation53 + $0x8] sm:$0xff] %vm698_vm1, %v2794_v12 }
0x14d0   :  { %3372 = vmatprep.mubr.msk.f32.mxu0 %vm698_vm1, %v2793_v13  ;;  %2800 = vst.msk [vmem:[#allocation53] sm:$0xff] %vm698_vm1, %v2793_v13 }
0x14d1   :  { %3373 = vmatmul.mubr.msk.f32.vlgmr.msra.gmra.mxu0 %vm698_vm1, %v2794_v12 }
0x14d2   :  { %4162 = shalt.err (!%p4159_p1)
}
0x14d3   :  { %2902 = dma.vmem_to_hbm [thread:$0]  %s2897_s6, 256, %s4531_s25, [#allocation4], %s4278_s0, %s4278_s0, %s4279_s22  }
0x14d4   :  { %v3050_v14 = vld [vmem:[%s4526_s13] ss:$0 sm:$0xff]  ;;  %s4312_s30 = smov [#allocation54]  }
0x14d5   :  { %s2908_s14 = sshll.u32 %s4312_s30, 4  ;;  %s2909_s14 = int_to_ptr.vmem [resolvable:$true] %s2908_s14 }
0x14d6   :  { %s4171_s12 = scalar_lea.vmem %s2909_s14, 256  ;;  %p4176_p3 = scmp.lt.s32.totalorder %s2909_s14, %s2909_s14 }
0x14d7   :  { %p4172_p2 = scmp.ne.s32.totalorder %s2909_s14, %s4171_s12  ;;  %p4177_p4 = scmp.lt.s32.totalorder %s4171_s12, %s4171_s12 }
0x14d9   :  { %p4178_p5 = por %p4177_p4, %p4176_p3 }
0x14db   :  { %p4179_p6 = pnand %p4178_p5, %p4172_p2 }
0x1591   :  { %v3374_v15 = vpop.f32.mrf.mxu0 }
0x1592   :  { %v2886_v16 = vadd.f32 %v3374_v15, %v3050_v14 }
0x1593   :  { %v2880_v17 = vpop.f32.mrf.mxu0 }
0x1594   :  { %2890 = vst.msk [vmem:[#allocation54 + $0x8] sm:$0xff] %vm610_vm0, %v2886_v16  ;;  %v2881_v18 = vadd.f32 %v3050_v14, %v2880_v17 }
0x1596   :  { %2889 = vst.msk [vmem:[#allocation54] sm:$0xff] %vm610_vm0, %v2881_v18 }
0x1597   :  { %4182 = shalt.err (!%p4179_p6)
}
0x1598   :  { %2914 = dma.vmem_to_hbm [thread:$0]  %s2909_s14, 256, %s4536_s5, [#allocation55], %s4278_s0, %s4278_s0, %s4279_s22  }
0x1599   :  { %4225 = dma.done.wait [#allocation4], 256  }
0x159a   :  { %4226 = vsyncadd [#allocation4], 4294967040 }
0x159b   :  { %4227 = dma.done.wait [#allocation55], 256  }
0x159c   :  { %4228 = vsyncadd [#allocation55], 4294967040 }
0x159d   :  { %2921 = vsyncpa [#allocation3], 1 }
0x159e   :  { %2922 = vsyncpa [#allocation6], 1 }
0x159f   :  { %2923 = vsyncpa [#allocation9], 1 }
0x15a0   :  { %2924 = vsyncpa [#allocation12], 1 }
0x15a1   :  { %2925 = vsyncpa [#allocation15], 1 }
0x15a2   :  { %2926 = vsyncpa [#allocation18], 1 }
0x15a3   :  { %2927 = vsyncpa [#allocation21], 1 }
0x15a4   :  { %2928 = vsyncpa [#allocation24], 1 }
0x15a5   :  { %2929 = vsyncpa [#allocation27], 1 }
0x15a6   :  { %2930 = vsyncpa [#allocation30], 1 }
0x15a7   :  { %2931 = vsyncpa [#allocation33], 1 }
0x15a8   :  { %2932 = vsyncpa [#allocation36], 1 }
0x15a9   :  { %2933 = vsyncpa [#allocation39], 1 }
0x15aa   :  { %2934 = vsyncpa [#allocation42], 1 }
0x15ab   :  { %2935 = vsyncpa [#allocation45], 1 }
0x15ac   :  { %2936 = vsyncpa [#allocation48], 1 }
0x15ad   :  { %2937 = vsyncpa [#allocation51], 1 }
0x15ae   :  { %2938 = vsyncpa [#allocation4], 1 }
0x15af   :  { %2939 = vsyncpa [#allocation55], 1 }

</bundles_post_ra>
